<compile_context>
chip_gen: v7x
topology: tpu7x:2x2x1
jax: 0.10.0
libtpu: 0.0.40
codegen_flags: <defaults>
</compile_context>

<pallas_src>
import functools

import jax
import jax.numpy as jnp
from jax import lax
from jax.experimental import pallas as pl
from jax.experimental.pallas import tpu as pltpu

EPS = 1e-5
LANE = 128


def _round_up(x, m):
    return (x + m - 1) // m * m


# --------------------------------------------------------------------------- #
# In-kernel 3x3 conv of one flattened, zero-padded row tile                     #
# --------------------------------------------------------------------------- #
def _conv_tile(x_ref, w_ref, *, tile_h, W):
    """x_ref: ((tile_h+2)*(W+2)+8, Cin) bf16, flat (padded_row, padded_col) order.
    w_ref: (9, Cin, Cout_p) bf16 (tap index = kh*3+kw).
    Returns (tile_h*(W+2), Cout_p) f32 where flat output row q = r*(W+2) + c;
    entries with c >= W are junk (wrapped windows) and must be masked/skipped."""
    Wp = W + 2
    Lv = tile_h * Wp
    x2 = x_ref[...]                                          # (Lw, Cin) bf16
    y = None
    for kh in range(3):
        for kw in range(3):
            off = kh * Wp + kw
            tap = x2[off:off + Lv, :]                        # (Lv, Cin) bf16
            part = jnp.dot(tap, w_ref[kh * 3 + kw],
                           preferred_element_type=jnp.float32)
            y = part if y is None else y + part
    return y


# --------------------------------------------------------------------------- #
# Pass 1: conv (recomputed, never written) -> per-image BN stat partials        #
# --------------------------------------------------------------------------- #
def _conv_stats_kernel(x_ref, w_ref, sum_ref, ssq_ref, *, tile_h, W):
    Wp = W + 2
    Lv = tile_h * Wp

    @pl.when(pl.program_id(1) == 0)                          # new image -> reset
    def _init():
        sum_ref[...] = jnp.zeros_like(sum_ref)
        ssq_ref[...] = jnp.zeros_like(ssq_ref)

    y = _conv_tile(x_ref, w_ref, tile_h=tile_h, W=W)         # (Lv, Cout_p) f32
    col = lax.broadcasted_iota(jnp.int32, (Lv, 1), 0) % Wp
    yv = jnp.where(col < W, y, 0.0)                          # mask wrapped columns
    sum_ref[...] += jnp.sum(yv, axis=0, keepdims=True)
    ssq_ref[...] += jnp.sum(yv * yv, axis=0, keepdims=True)


# --------------------------------------------------------------------------- #
# Pass 2: conv recompute + BN affine (precomputed scale/shift) + PReLU          #
# --------------------------------------------------------------------------- #
def _conv_bn_act_kernel(x_ref, w_ref, scale_ref, shift_ref, alpha_ref, o_ref,
                        *, tile_h, W):
    Wp = W + 2
    y = _conv_tile(x_ref, w_ref, tile_h=tile_h, W=W)
    z = y * scale_ref[...] + shift_ref[...]
    z = jnp.where(z >= 0.0, z, alpha_ref[...] * z)
    for r in range(tile_h):                                  # lane-dense row stores
        o_ref[r, :, :] = z[r * Wp:r * Wp + W, :]


# --------------------------------------------------------------------------- #
# Tiling / VMEM sizing                                                          #
# --------------------------------------------------------------------------- #
def _est_vmem_bytes(tile_h, W, Cin, Cout_p):
    Wp = W + 2
    Lv = _round_up(tile_h * Wp, 16)
    Lw = _round_up((tile_h + 2) * Wp + 8, 16)
    cin_l = _round_up(Cin, LANE)
    x_blk = Lw * cin_l * 2                                   # bf16 input slab
    w_blk = 9 * _round_up(Cin, 16) * Cout_p * 2              # bf16 packed weights
    temps = 2 * Lv * cin_l * 2 + 3 * Lv * Cout_p * 4         # tap copies + f32 acc
    return 2 * (x_blk + w_blk) + temps + (2 << 20)


def _pick_tile_h(H, W, Cin, Cout_p, max_rows):
    best = 1
    for d in range(1, min(H, 64) + 1):                       # cap unroll of stores
        if H % d:
            continue
        if d * (W + 2) > max_rows:
            continue
        if _est_vmem_bytes(d, W, Cin, Cout_p) > (12 << 20):
            continue
        best = d
    return best


# --------------------------------------------------------------------------- #
# Wrapper                                                                       #
# --------------------------------------------------------------------------- #
def conv_block_forward(x_nchw, weight, gamma, beta, alpha, *, max_tile_rows=2048):
    """x_nchw: (N, Cin, H, W); weight: (Cout, Cin, 3, 3); gamma/beta/alpha: (Cout,)."""
    N, Cin, H, W = x_nchw.shape
    Cout = weight.shape[0]
    Wp = W + 2
    Cout_p = Cout if Cout % LANE == 0 else _round_up(Cout, LANE)

    tile_h = _pick_tile_h(H, W, Cin, Cout_p, max_tile_rows)
    T = H // tile_h
    Lw = (tile_h + 2) * Wp + 8
    M = N * H * W
    vmem_limit = int(min(max(2 * _est_vmem_bytes(tile_h, W, Cin, Cout_p), 16 << 20),
                         48 << 20))

    # ---- XLA-side layout prep: one ~1.07x bf16 copy of x (halo row tiles) -------
    x = jnp.transpose(x_nchw, (0, 2, 3, 1)).astype(jnp.bfloat16)        # NHWC
    xp = jnp.pad(x, ((0, 0), (1, 1), (1, 1), (0, 0)))                   # (N,H+2,Wp,Cin)
    xt = jnp.stack([xp[:, t * tile_h: t * tile_h + tile_h + 2]
                    for t in range(T)], axis=1)                         # halo windows
    xt = xt.reshape(N, T, (tile_h + 2) * Wp, Cin)
    xt = jnp.pad(xt, ((0, 0), (0, 0), (0, Lw - (tile_h + 2) * Wp), (0, 0)))

    # (Cout,Cin,3,3) -> (3,3,Cin,Cout) -> (9, Cin, Cout_p) bf16, tap index kh*3+kw.
    w = jnp.transpose(weight, (2, 3, 1, 0)).reshape(9 * Cin, Cout)
    w = jnp.pad(w, ((0, 0), (0, Cout_p - Cout))).astype(jnp.bfloat16)
    w = w.reshape(9, Cin, Cout_p)

    x_spec = pl.BlockSpec((None, None, Lw, Cin), lambda n, t: (n, t, 0, 0))
    w_spec = pl.BlockSpec((9, Cin, Cout_p), lambda n, t: (0, 0, 0))
    vec_spec = pl.BlockSpec((1, Cout_p), lambda n, t: (0, 0))
    stat_spec = pl.BlockSpec((None, 1, Cout_p), lambda n, t: (n, 0, 0))

    # ---- pass 1: BN statistics (per-image partials, batch axis parallel) --------
    sums, ssqs = pl.pallas_call(
        functools.partial(_conv_stats_kernel, tile_h=tile_h, W=W),
        grid=(N, T),
        in_specs=[x_spec, w_spec],
        out_specs=[stat_spec, stat_spec],
        out_shape=(jax.ShapeDtypeStruct((N, 1, Cout_p), jnp.float32),
                   jax.ShapeDtypeStruct((N, 1, Cout_p), jnp.float32)),
        compiler_params=pltpu.CompilerParams(
            dimension_semantics=("parallel", "arbitrary"),
            vmem_limit_bytes=vmem_limit),
    )(xt, w)

    # ---- tiny per-channel finalize (training-mode batch stats, biased var) ------
    # TODO(synk): E[y^2]-E[y]^2 in f32 can cancel for |mean| >> std; switch to a
    # Welford-style accumulation if this ever feeds training-critical statistics.
    ch_sum = jnp.sum(sums[:, 0, :], axis=0)
    ch_ssq = jnp.sum(ssqs[:, 0, :], axis=0)
    inv_m = 1.0 / float(M)                       # padded lanes give 0 -> harmless
    mean = ch_sum * inv_m
    var = jnp.maximum(ch_ssq * inv_m - mean * mean, 0.0)
    inv_std = lax.rsqrt(var + EPS)
    g = jnp.pad(gamma.astype(jnp.float32), (0, Cout_p - Cout))
    b = jnp.pad(beta.astype(jnp.float32), (0, Cout_p - Cout))
    a = jnp.pad(alpha.astype(jnp.float32), (0, Cout_p - Cout)).reshape(1, Cout_p)
    scale = (g * inv_std).reshape(1, Cout_p)
    shift = (b - mean * g * inv_std).reshape(1, Cout_p)

    # ---- pass 2: conv recompute + BN affine + PReLU -> final NHWC_p output ------
    out = pl.pallas_call(
        functools.partial(_conv_bn_act_kernel, tile_h=tile_h, W=W),
        grid=(N, T),
        in_specs=[x_spec, w_spec, vec_spec, vec_spec, vec_spec],
        out_specs=pl.BlockSpec((None, tile_h, W, Cout_p), lambda n, t: (n, t, 0, 0)),
        out_shape=jax.ShapeDtypeStruct((N, H, W, Cout_p), jnp.float32),
        compiler_params=pltpu.CompilerParams(
            dimension_semantics=("parallel", "parallel"),
            vmem_limit_bytes=vmem_limit),
    )(xt, w, scale, shift, a)

    if Cout_p != Cout:
        out = out[..., :Cout]
    # TODO(synk): return NHWC to a chained ConvBlock consumer to skip this transpose.
    return jnp.transpose(out, (0, 3, 1, 2))                  # back to NCHW


def _reference(x_nchw, weight, gamma, beta, alpha):
    """Pure-JAX f32 reference (Conv2d -> training-mode BN -> PReLU)."""
    x = x_nchw.astype(jnp.float32)
    y = lax.conv_general_dilated(
        x, weight.astype(jnp.float32), window_strides=(1, 1), padding="SAME",
        dimension_numbers=("NCHW", "OIHW", "NCHW"))
    mean = jnp.mean(y, axis=(0, 2, 3), keepdims=True)
    var = jnp.mean((y - mean) ** 2, axis=(0, 2, 3), keepdims=True)
    y = (y - mean) * lax.rsqrt(var + EPS)
    y = y * gamma.reshape(1, -1, 1, 1) + beta.reshape(1, -1, 1, 1)
    return jnp.where(y >= 0.0, y, alpha.reshape(1, -1, 1, 1) * y)


if __name__ == "__main__":
    N, Cin, H, W = 2, 4, 16, 16
    Cout = 8

    key = jax.random.PRNGKey(0)
    kx, kw = jax.random.split(key)
    x = jax.random.normal(kx, (N, Cin, H, W), dtype=jnp.float32)

    fan_in = Cin * 3 * 3
    weight = jax.random.uniform(kw, (Cout, Cin, 3, 3), jnp.float32,
                                minval=-1.0, maxval=1.0) / jnp.sqrt(fan_in)
    gamma = jnp.ones((Cout,), jnp.float32)         # BN weight
    beta = jnp.zeros((Cout,), jnp.float32)         # BN bias
    alpha = jnp.full((Cout,), 0.25, jnp.float32)   # PReLU per-channel init

    # Small row budget so the test exercises a multi-tile grid (tile_h=8, T=2).
    out = conv_block_forward(x, weight, gamma, beta, alpha, max_tile_rows=160)
    jax.block_until_ready(out)

    ref = _reference(x, weight, gamma, beta, alpha)
    assert out.shape == (N, Cout, H, W)
    # Tolerance loosened vs the f32 reference because matmul operands are bf16.
    assert jnp.allclose(out, ref, atol=3e-2, rtol=3e-2), \
        float(jnp.max(jnp.abs(out - ref)))

    print("KERNEL_OK")
</pallas_src>

<mosaic_0001>
module attributes {stable_mosaic.version = 11 : i64} {
  func.func @_conv_stats_kernel(%arg0: i32, %arg1: i32, %arg2: memref<1x1x188x4xbf16, #tpu.memory_space<vmem>>, %arg3: memref<9x4x128xbf16, #tpu.memory_space<vmem>>, %arg4: memref<1x1x128xf32, #tpu.memory_space<vmem>>, %arg5: memref<1x1x128xf32, #tpu.memory_space<vmem>>) attributes {dimension_semantics = [#tpu.dimension_semantics<parallel>, #tpu.dimension_semantics<arbitrary>], iteration_bounds = array<i64: 2, 2>, scalar_prefetch = 0 : i64, scratch_operands = 0 : i64, tpu.core_type = #tpu.core_type<tc>, window_params = [{transform_indices = @transform_0, window_bounds = array<i64: 1, 1, 188, 4>}, {pipeline_mode = #tpu.pipeline_mode<synchronous>, transform_indices = @transform_1, window_bounds = array<i64: 9, 4, 128>}, {transform_indices = @transform_2, window_bounds = array<i64: 1, 1, 128>}, {transform_indices = @transform_3, window_bounds = array<i64: 1, 1, 128>}]} {
    %c0_i32 = arith.constant 0 : i32
    %0 = arith.cmpi eq, %arg1, %c0_i32 : i32
    %1 = arith.extui %0 : i1 to i32
    %c0_i32_0 = arith.constant 0 : i32
    %2 = arith.cmpi ne, %1, %c0_i32_0 : i32
    scf.if %2 {
      %cst_50 = arith.constant 0.000000e+00 : f32
      %89 = vector.broadcast %cst_50 : f32 to vector<1x128xf32>
      %c0_51 = arith.constant 0 : index
      %c0_52 = arith.constant 0 : index
      %c0_53 = arith.constant 0 : index
      %90 = vector.load %arg4[%c0_51, %c0_52, %c0_53] : memref<1x1x128xf32, #tpu.memory_space<vmem>>, vector<1x1x128xf32>
      %91 = vector.shape_cast %90 : vector<1x1x128xf32> to vector<1x128xf32>
      %92 = vector.shape_cast %89 : vector<1x128xf32> to vector<1x1x128xf32>
      tpu.vector_store %arg4[%c0_51, %c0_52, %c0_53], %92 {strides = array<i32>} : memref<1x1x128xf32, #tpu.memory_space<vmem>>, vector<1x1x128xf32>,
      %cst_54 = arith.constant 0.000000e+00 : f32
      %93 = vector.broadcast %cst_54 : f32 to vector<1x128xf32>
      %c0_55 = arith.constant 0 : index
      %c0_56 = arith.constant 0 : index
      %c0_57 = arith.constant 0 : index
      %94 = vector.load %arg5[%c0_55, %c0_56, %c0_57] : memref<1x1x128xf32, #tpu.memory_space<vmem>>, vector<1x1x128xf32>
      %95 = vector.shape_cast %94 : vector<1x1x128xf32> to vector<1x128xf32>
      %96 = vector.shape_cast %93 : vector<1x128xf32> to vector<1x1x128xf32>
      tpu.vector_store %arg5[%c0_55, %c0_56, %c0_57], %96 {strides = array<i32>} : memref<1x1x128xf32, #tpu.memory_space<vmem>>, vector<1x1x128xf32>,
    } else {
    }
    %c0 = arith.constant 0 : index
    %c0_1 = arith.constant 0 : index
    %c0_2 = arith.constant 0 : index
    %c0_3 = arith.constant 0 : index
    %3 = vector.load %arg2[%c0, %c0_1, %c0_2, %c0_3] : memref<1x1x188x4xbf16, #tpu.memory_space<vmem>>, vector<1x1x188x4xbf16>
    %4 = vector.shape_cast %3 : vector<1x1x188x4xbf16> to vector<188x4xbf16>
    %5 = vector.extract_strided_slice %4 {offsets = [0, 0], sizes = [144, 4], strides = [1, 1]} : vector<188x4xbf16> to vector<144x4xbf16>
    %c0_4 = arith.constant 0 : index
    %c0_5 = arith.constant 0 : index
    %c0_6 = arith.constant 0 : index
    %6 = vector.load %arg3[%c0_4, %c0_5, %c0_6] : memref<9x4x128xbf16, #tpu.memory_space<vmem>>, vector<1x4x128xbf16>
    %7 = vector.shape_cast %6 : vector<1x4x128xbf16> to vector<4x128xbf16>
    %cst = arith.constant dense<0.000000e+00> : vector<144x128xf32>
    %8 = tpu.matmul %5, %7, %cst {dimension_numbers = #tpu.dot_dimension_numbers<[1], [0], [0], [1], [0, 0, 1, 1], [], []>} : vector<144x4xbf16>, vector<4x128xbf16>, vector<144x128xf32> -> vector<144x128xf32>
    %9 = vector.extract_strided_slice %4 {offsets = [1, 0], sizes = [144, 4], strides = [1, 1]} : vector<188x4xbf16> to vector<144x4xbf16>
    %c1 = arith.constant 1 : index
    %c0_7 = arith.constant 0 : index
    %c0_8 = arith.constant 0 : index
    %10 = vector.load %arg3[%c1, %c0_7, %c0_8] : memref<9x4x128xbf16, #tpu.memory_space<vmem>>, vector<1x4x128xbf16>
    %11 = vector.shape_cast %10 : vector<1x4x128xbf16> to vector<4x128xbf16>
    %cst_9 = arith.constant dense<0.000000e+00> : vector<144x128xf32>
    %12 = tpu.matmul %9, %11, %cst_9 {dimension_numbers = #tpu.dot_dimension_numbers<[1], [0], [0], [1], [0, 0, 1, 1], [], []>} : vector<144x4xbf16>, vector<4x128xbf16>, vector<144x128xf32> -> vector<144x128xf32>
    %13 = arith.addf %8, %12 : vector<144x128xf32>
    %14 = vector.extract_strided_slice %4 {offsets = [2, 0], sizes = [144, 4], strides = [1, 1]} : vector<188x4xbf16> to vector<144x4xbf16>
    %c2 = arith.constant 2 : index
    %c0_10 = arith.constant 0 : index
    %c0_11 = arith.constant 0 : index
    %15 = vector.load %arg3[%c2, %c0_10, %c0_11] : memref<9x4x128xbf16, #tpu.memory_space<vmem>>, vector<1x4x128xbf16>
    %16 = vector.shape_cast %15 : vector<1x4x128xbf16> to vector<4x128xbf16>
    %cst_12 = arith.constant dense<0.000000e+00> : vector<144x128xf32>
    %17 = tpu.matmul %14, %16, %cst_12 {dimension_numbers = #tpu.dot_dimension_numbers<[1], [0], [0], [1], [0, 0, 1, 1], [], []>} : vector<144x4xbf16>, vector<4x128xbf16>, vector<144x128xf32> -> vector<144x128xf32>
    %18 = arith.addf %13, %17 : vector<144x128xf32>
    %19 = vector.extract_strided_slice %4 {offsets = [18, 0], sizes = [144, 4], strides = [1, 1]} : vector<188x4xbf16> to vector<144x4xbf16>
    %c3 = arith.constant 3 : index
    %c0_13 = arith.constant 0 : index
    %c0_14 = arith.constant 0 : index
    %20 = vector.load %arg3[%c3, %c0_13, %c0_14] : memref<9x4x128xbf16, #tpu.memory_space<vmem>>, vector<1x4x128xbf16>
    %21 = vector.shape_cast %20 : vector<1x4x128xbf16> to vector<4x128xbf16>
    %cst_15 = arith.constant dense<0.000000e+00> : vector<144x128xf32>
    %22 = tpu.matmul %19, %21, %cst_15 {dimension_numbers = #tpu.dot_dimension_numbers<[1], [0], [0], [1], [0, 0, 1, 1], [], []>} : vector<144x4xbf16>, vector<4x128xbf16>, vector<144x128xf32> -> vector<144x128xf32>
    %23 = arith.addf %18, %22 : vector<144x128xf32>
    %24 = vector.extract_strided_slice %4 {offsets = [19, 0], sizes = [144, 4], strides = [1, 1]} : vector<188x4xbf16> to vector<144x4xbf16>
    %c4 = arith.constant 4 : index
    %c0_16 = arith.constant 0 : index
    %c0_17 = arith.constant 0 : index
    %25 = vector.load %arg3[%c4, %c0_16, %c0_17] : memref<9x4x128xbf16, #tpu.memory_space<vmem>>, vector<1x4x128xbf16>
    %26 = vector.shape_cast %25 : vector<1x4x128xbf16> to vector<4x128xbf16>
    %cst_18 = arith.constant dense<0.000000e+00> : vector<144x128xf32>
    %27 = tpu.matmul %24, %26, %cst_18 {dimension_numbers = #tpu.dot_dimension_numbers<[1], [0], [0], [1], [0, 0, 1, 1], [], []>} : vector<144x4xbf16>, vector<4x128xbf16>, vector<144x128xf32> -> vector<144x128xf32>
    %28 = arith.addf %23, %27 : vector<144x128xf32>
    %29 = vector.extract_strided_slice %4 {offsets = [20, 0], sizes = [144, 4], strides = [1, 1]} : vector<188x4xbf16> to vector<144x4xbf16>
    %c5 = arith.constant 5 : index
    %c0_19 = arith.constant 0 : index
    %c0_20 = arith.constant 0 : index
    %30 = vector.load %arg3[%c5, %c0_19, %c0_20] : memref<9x4x128xbf16, #tpu.memory_space<vmem>>, vector<1x4x128xbf16>
    %31 = vector.shape_cast %30 : vector<1x4x128xbf16> to vector<4x128xbf16>
    %cst_21 = arith.constant dense<0.000000e+00> : vector<144x128xf32>
    %32 = tpu.matmul %29, %31, %cst_21 {dimension_numbers = #tpu.dot_dimension_numbers<[1], [0], [0], [1], [0, 0, 1, 1], [], []>} : vector<144x4xbf16>, vector<4x128xbf16>, vector<144x128xf32> -> vector<144x128xf32>
    %33 = arith.addf %28, %32 : vector<144x128xf32>
    %34 = vector.extract_strided_slice %4 {offsets = [36, 0], sizes = [144, 4], strides = [1, 1]} : vector<188x4xbf16> to vector<144x4xbf16>
    %c6 = arith.constant 6 : index
    %c0_22 = arith.constant 0 : index
    %c0_23 = arith.constant 0 : index
    %35 = vector.load %arg3[%c6, %c0_22, %c0_23] : memref<9x4x128xbf16, #tpu.memory_space<vmem>>, vector<1x4x128xbf16>
    %36 = vector.shape_cast %35 : vector<1x4x128xbf16> to vector<4x128xbf16>
    %cst_24 = arith.constant dense<0.000000e+00> : vector<144x128xf32>
    %37 = tpu.matmul %34, %36, %cst_24 {dimension_numbers = #tpu.dot_dimension_numbers<[1], [0], [0], [1], [0, 0, 1, 1], [], []>} : vector<144x4xbf16>, vector<4x128xbf16>, vector<144x128xf32> -> vector<144x128xf32>
    %38 = arith.addf %33, %37 : vector<144x128xf32>
    %39 = vector.extract_strided_slice %4 {offsets = [37, 0], sizes = [144, 4], strides = [1, 1]} : vector<188x4xbf16> to vector<144x4xbf16>
    %c7 = arith.constant 7 : index
    %c0_25 = arith.constant 0 : index
    %c0_26 = arith.constant 0 : index
    %40 = vector.load %arg3[%c7, %c0_25, %c0_26] : memref<9x4x128xbf16, #tpu.memory_space<vmem>>, vector<1x4x128xbf16>
    %41 = vector.shape_cast %40 : vector<1x4x128xbf16> to vector<4x128xbf16>
    %cst_27 = arith.constant dense<0.000000e+00> : vector<144x128xf32>
    %42 = tpu.matmul %39, %41, %cst_27 {dimension_numbers = #tpu.dot_dimension_numbers<[1], [0], [0], [1], [0, 0, 1, 1], [], []>} : vector<144x4xbf16>, vector<4x128xbf16>, vector<144x128xf32> -> vector<144x128xf32>
    %43 = arith.addf %38, %42 : vector<144x128xf32>
    %44 = vector.extract_strided_slice %4 {offsets = [38, 0], sizes = [144, 4], strides = [1, 1]} : vector<188x4xbf16> to vector<144x4xbf16>
    %c8 = arith.constant 8 : index
    %c0_28 = arith.constant 0 : index
    %c0_29 = arith.constant 0 : index
    %45 = vector.load %arg3[%c8, %c0_28, %c0_29] : memref<9x4x128xbf16, #tpu.memory_space<vmem>>, vector<1x4x128xbf16>
    %46 = vector.shape_cast %45 : vector<1x4x128xbf16> to vector<4x128xbf16>
    %cst_30 = arith.constant dense<0.000000e+00> : vector<144x128xf32>
    %47 = tpu.matmul %44, %46, %cst_30 {dimension_numbers = #tpu.dot_dimension_numbers<[1], [0], [0], [1], [0, 0, 1, 1], [], []>} : vector<144x4xbf16>, vector<4x128xbf16>, vector<144x128xf32> -> vector<144x128xf32>
    %48 = arith.addf %43, %47 : vector<144x128xf32>
    %49 = tpu.iota {dimensions = array<i32: 0>} : vector<144x1xi32>
    %c18_i32 = arith.constant 18 : i32
    %c0_i32_31 = arith.constant 0 : i32
    %50 = arith.cmpi eq, %c18_i32, %c0_i32_31 : i32
    %c1_i32 = arith.constant 1 : i32
    %51 = arith.select %50, %c1_i32, %c18_i32 : i32
    %52 = vector.broadcast %51 : i32 to vector<144x1xi32>
    %53 = arith.remsi %49, %52 : vector<144x1xi32>
    %c0_i32_32 = arith.constant 0 : i32
    %54 = vector.broadcast %c0_i32_32 : i32 to vector<144x1xi32>
    %55 = arith.cmpi ne, %53, %54 : vector<144x1xi32>
    %c0_i32_33 = arith.constant 0 : i32
    %56 = vector.broadcast %c0_i32_33 : i32 to vector<144x1xi32>
    %57 = arith.cmpi slt, %53, %56 : vector<144x1xi32>
    %c0_i32_34 = arith.constant 0 : i32
    %58 = arith.cmpi slt, %51, %c0_i32_34 : i32
    %59 = vector.broadcast %58 : i1 to vector<144x1xi1>
    %60 = vector.broadcast %59 : vector<144x1xi1> to vector<144x1xi1>
    %61 = arith.xori %57, %60 : vector<144x1xi1>
    %62 = arith.andi %61, %55 : vector<144x1xi1>
    %63 = vector.broadcast %51 : i32 to vector<144x1xi32>
    %64 = arith.addi %53, %63 : vector<144x1xi32>
    %65 = arith.select %62, %64, %53 : vector<144x1xi1>, vector<144x1xi32>
    %c16_i32 = arith.constant 16 : i32
    %66 = vector.broadcast %c16_i32 : i32 to vector<144x1xi32>
    %67 = arith.cmpi slt, %65, %66 : vector<144x1xi32>
    %cst_35 = arith.constant 0.000000e+00 : f32
    %68 = vector.shape_cast %67 : vector<144x1xi1> to vector<144x1xi1>
    %69 = vector.broadcast %68 : vector<144x1xi1> to vector<144x128xi1>
    %70 = vector.broadcast %cst_35 : f32 to vector<144x128xf32>
    %71 = arith.select %69, %48, %70 : vector<144x128xi1>, vector<144x128xf32>
    %c0_36 = arith.constant 0 : index
    %c0_37 = arith.constant 0 : index
    %c0_38 = arith.constant 0 : index
    %72 = vector.load %arg4[%c0_36, %c0_37, %c0_38] : memref<1x1x128xf32, #tpu.memory_space<vmem>>, vector<1x1x128xf32>
    %73 = vector.shape_cast %72 : vector<1x1x128xf32> to vector<1x128xf32>
    %cst_39 = arith.constant dense<0.000000e+00> : vector<128xf32>
    %74 = vector.multi_reduction <add>, %71, %cst_39 [0] : vector<144x128xf32> to vector<128xf32>
    %75 = vector.shape_cast %74 : vector<128xf32> to vector<1x128xf32>
    %76 = arith.addf %73, %75 : vector<1x128xf32>
    %c0_40 = arith.constant 0 : index
    %c0_41 = arith.constant 0 : index
    %c0_42 = arith.constant 0 : index
    %77 = vector.load %arg4[%c0_40, %c0_41, %c0_42] : memref<1x1x128xf32, #tpu.memory_space<vmem>>, vector<1x1x128xf32>
    %78 = vector.shape_cast %77 : vector<1x1x128xf32> to vector<1x128xf32>
    %79 = vector.shape_cast %76 : vector<1x128xf32> to vector<1x1x128xf32>
    tpu.vector_store %arg4[%c0_40, %c0_41, %c0_42], %79 {strides = array<i32>} : memref<1x1x128xf32, #tpu.memory_space<vmem>>, vector<1x1x128xf32>,
    %c0_43 = arith.constant 0 : index
    %c0_44 = arith.constant 0 : index
    %c0_45 = arith.constant 0 : index
    %80 = vector.load %arg5[%c0_43, %c0_44, %c0_45] : memref<1x1x128xf32, #tpu.memory_space<vmem>>, vector<1x1x128xf32>
    %81 = vector.shape_cast %80 : vector<1x1x128xf32> to vector<1x128xf32>
    %82 = arith.mulf %71, %71 : vector<144x128xf32>
    %cst_46 = arith.constant dense<0.000000e+00> : vector<128xf32>
    %83 = vector.multi_reduction <add>, %82, %cst_46 [0] : vector<144x128xf32> to vector<128xf32>
    %84 = vector.shape_cast %83 : vector<128xf32> to vector<1x128xf32>
    %85 = arith.addf %81, %84 : vector<1x128xf32>
    %c0_47 = arith.constant 0 : index
    %c0_48 = arith.constant 0 : index
    %c0_49 = arith.constant 0 : index
    %86 = vector.load %arg5[%c0_47, %c0_48, %c0_49] : memref<1x1x128xf32, #tpu.memory_space<vmem>>, vector<1x1x128xf32>
    %87 = vector.shape_cast %86 : vector<1x1x128xf32> to vector<1x128xf32>
    %88 = vector.shape_cast %85 : vector<1x128xf32> to vector<1x1x128xf32>
    tpu.vector_store %arg5[%c0_47, %c0_48, %c0_49], %88 {strides = array<i32>} : memref<1x1x128xf32, #tpu.memory_space<vmem>>, vector<1x1x128xf32>,
    return
  }
  func.func @transform_0(%arg0: i32, %arg1: i32) -> (i32, i32, i32, i32) {
    %c0_i32 = arith.constant 0 : i32
    %c0_i32_0 = arith.constant 0 : i32
    %c0_i32_1 = arith.constant 0 : i32
    return %arg0, %arg1, %c0_i32, %c0_i32_0 : i32, i32, i32, i32
  }
  func.func @transform_1(%arg0: i32, %arg1: i32) -> (i32, i32, i32) {
    %c0_i32 = arith.constant 0 : i32
    %c0_i32_0 = arith.constant 0 : i32
    %c0_i32_1 = arith.constant 0 : i32
    %c0_i32_2 = arith.constant 0 : i32
    return %c0_i32, %c0_i32_0, %c0_i32_1 : i32, i32, i32
  }
  func.func @transform_2(%arg0: i32, %arg1: i32) -> (i32, i32, i32) {
    %c0_i32 = arith.constant 0 : i32
    %c0_i32_0 = arith.constant 0 : i32
    %c0_i32_1 = arith.constant 0 : i32
    return %arg0, %c0_i32, %c0_i32_0 : i32, i32, i32
  }
  func.func @transform_3(%arg0: i32, %arg1: i32) -> (i32, i32, i32) {
    %c0_i32 = arith.constant 0 : i32
    %c0_i32_0 = arith.constant 0 : i32
    %c0_i32_1 = arith.constant 0 : i32
    return %arg0, %c0_i32, %c0_i32_0 : i32, i32, i32
  }
}

</mosaic_0001>

<bundles_post_ra>
// kernel: tpu_custom_call.1
= control target key start
LH: loop header
LB: loop body
LE: loop exit
PB: predicated region body
PF: predicated region fallthrough
CT: control target
= control target key end

     0   :  { %9 = vsyncpa [#allocation3], 0  ;;  %s4709_s0 = inlined_call_operand.vmem [shape: bf16[2,2,188,4], index: 0, kind: input, shape index: {}]   ;;  %s4710_s1 = inlined_call_operand.vmem [shape: bf16[9,4,128], index: 1, kind: input, shape index: {}]   ;;  %s4711_s2 = inlined_call_operand.hbm [shape: f32[2,1,128], index: 2, kind: output, shape index: {0}]   ;;  %s4712_s3 = inlined_call_operand.hbm [shape: f32[2,1,128], index: 3, kind: output, shape index: {1}]  }
   0x1   :  { %11 = vsyncpa [#allocation3 + $0x1], 0 }
   0x2   :  { %12 = vsyncpa [#allocation5], 0 }
   0x3   :  { %14 = vsyncpa [#allocation5 + $0x1], 0  ;;  %s3532_s12 = smov 0   ;;  %s3534_s13 = smov 0  }
   0x4   :  { %s3536_s14 = smov 0   ;;  %s3538_s15 = smov 0  }
   0x5   :  { %s3540_s16 = smov 0   ;;  %s3542_s17 = smov 0  }
   0x6   :  { %s3544_s18 = smov 0   ;;  %s3546_s19 = smov 0  }
   0x7 LB: > { %s2430_s20 = sadd.s32 4294967295, %s3505_s19   ;;  %s2431_s21 = sadd.s32 4294967294, %s3505_s19   ;;  %s3505_s19 = sphi %s3546_s19, %s20_s19   ;;  %s3501_s18 = sphi %s3544_s18, %s4763_s18   ;;  %s3497_s17 = sphi %s3542_s17, %s4762_s17   ;;  %s3493_s16 = sphi %s3540_s16, %s4761_s16   ;;  %s3489_s15 = sphi %s3538_s15, %s4760_s15   ;;  %s3485_s14 = sphi %s3536_s14, %s4759_s14   ;;  %s3481_s13 = sphi %s3534_s13, %s4758_s13   ;;  %s3477_s12 = sphi %s3532_s12, %s4757_s12  }
   0x8   : > { %s29_s22 = sadd.s32 1, %s3497_s17  ;;  %s32_s23 = sadd.s32 1, %s3501_s18 }
   0x9   : > { %p30_p0 = scmp.ge.s32.totalorder %s29_s22, 2  ;;  %p98_p1 = scmp.ne.s32.totalorder %s3485_s14, %s3481_s13 }
   0xa   : > { %p99_p2 = scmp.eq.s32.totalorder %s2430_s20, 3  ;;  %p104_p4 = scmp.ne.s32.totalorder %s3481_s13, %s3477_s12 }
   0xb   : > { %s4765_s22 = smov (%p30_p0, %s29_s22), 0  ;;  %s4767_s23 = smov (!%p30_p0, %s32_s23), %s3501_s18 }
   0xc   : > { %p3581_p3 = por %p99_p2, %p98_p1  ;;  %p34_p5 = scmp.ge.s32.totalorder %s4767_s23, 2 }
   0xd   : > { %p105_p6 = scmp.eq.s32.totalorder %s2431_s21, 3  ;;  %p2434_p7 = scmp.ge.s32.totalorder %s3505_s19, 1 }
   0xe   : > { %p164_p8 = scmp.lt.s32.totalorder %s3505_s19, 5  ;;  %s4769_s23 = smov (%p34_p5, %s4767_s23), 0 }
   0xf   : > { %p3591_p9 = por %p105_p6, %p104_p4  ;;  %s85_s26 = ssub.s32 %s3501_s18, %s4769_s23 }
  0x10   : > { %p165_p10 = pnand %p2434_p7, %p164_p8  ;;  %s88_s27 = sadd.s32 1, %s3485_s14 }
  0x11   : > { %p86_p11 = scmp.eq.s32.totalorder %s85_s26, 0  ;;  %s3602_s29 = sand.u32 (!%p165_p10), 1, %s3481_s13  }
  0x12   : > { %168 = sbr.rel (%p165_p10) target bundleno = 637 (0x27d), region = 28  ;;  %p195_p12 = scmp.lt.s32.totalorder (!%p165_p10), %s3493_s16, 1 }
  0x13   : > { %s3599_s28 = scalar_select %p86_p11, %s3485_s14, %s88_s27  }
  0x14   : > { %p197_p13 = scmp.lt.s32.totalorder (!%p165_p10), %s3489_s15, 1  ;;  %s3614_s20 = scalar_lea.vmem (!%p165_p10), [#allocation2], %s3602_s29 }
  0x15   : > { %s3617_s21 = scalar_lea.vmem (!%p165_p10), [#allocation4], %s3602_s29  ;;  %p2436_p0 = scmp.ne.s32.totalorder (!%p165_p10), %s3489_s15, 0 }
  0x19   : > { %s196_s30 = scalar_select %p195_p12, %s3493_s16, 1 }
  0x1a   : > { %s198_s5 = scalar_select %p197_p13, %s3489_s15, 1 }
  0x1b   : > { %s3249_s4 = smul.u32 48, %s196_s30  ;;  %v3507_v0 = vmov (!%p2436_p0), 0.0  }
  0x1c   : > { %s3248_s6 = smul.u32 24, %s198_s5  ;;  %209 = vst [vmem:[%s3614_s20] sm:$0x1] (!%p2436_p0), %v3507_v0  ;;  %210 = vst [vmem:[%s3617_s21] sm:$0x1] (!%p2436_p0), %v3507_v0 }
  0x1d   : > { %208 = sbr.rel (%p2436_p0) target bundleno = 36 (0x24), region = 32 }
  0x1e   : > { %s201_s7 = sadd.s32 %s3249_s4, %s3248_s6 }
  0x1f   : > { %s2435_s8 = sshll.u32 %s201_s7, 2 }
  0x20   : > { %s3611_s11 = scalar_lea.vmem %s4709_s0, %s2435_s8 }
  0x24 PF: > { %vm390_vm0 = vcmask 1041408   ;;  %v2488_v1 = vld [vmem:[%s4710_s1 + $0x8] sm:$0x3]  ;;  %v2437_v2 = vld [vmem:[%s4710_s1 + $0x2] sm:$0x3]  ;;  %v3508_v3 = vmov 0.0  }
  0x25   : > { %2786 = vmatprep.subr.bf16.mxu0 %v3508_v3  ;;  %2634 = vmatprep.subr.bf16.mxu1 %v3508_v3  ;;  %v3631_v4 = vsel %vm390_vm0, %v2488_v1, 0  ;;  %v392_v5 = vsel %vm390_vm0, %v2437_v2, 0  ;;  %v3635_v6 = vld [vmem:[%s3611_s11] sm:$0xff]   ;;  %vm3509_vm1 = vmmov 0   ;;  %v3643_v7 = vld [vmem:[%s3611_s11 + $0x8] sm:$0xff]   ;;  %v3649_v10 = vld [vmem:[%s3611_s11 + $0x10] sm:$0xff]  }
  0x26   : > { %2787 = vmatpush3.bf16.msra.mxu0 %v3631_v4  ;;  %2635 = vmatpush3.bf16.msra.mxu1 %v392_v5  ;;  %vm285_vm2 = vsmask.f32 7424  ;;  %v287_v8 = vshrl.u32 %v3635_v6, 16  ;;  %v289_v9 = vshll.u32 %v3635_v6, 16  ;;  %v294_v12 = vshll.u32 %v3643_v7, 16  ;;  %v3664_v17 = vld [vmem:[%s3611_s11 + $0x18] sm:$0xff]  }
  0x27   : > { %2636 = vmatprep.mubr.msk.bf16.mxu1 %vm3509_vm1, %v3508_v3  ;;  %2788 = vmatprep.mubr.msk.bf16.mxu0 %vm3509_vm1, %v3508_v3  ;;  %v298_v13 = vshrl.u32 %v3643_v7, 16  ;;  %vm946_vm3 = vsmask.f32 6400  ;;  %vm362_vm4 = vcmask 31744   ;;  %v3655_v14 = vshll.u32 %v3649_v10, 16  ;;  %v3674_v28 = vld [vmem:[%s3611_s11 + $0x20] sm:$0xff]  }
  0x28   : > { %2824 = vmatprep.subr.bf16.mxu0 %v3508_v3  ;;  %2672 = vmatprep.subr.bf16.mxu1 %v3508_v3  ;;  %v291_v11 = vrot.slane %v289_v9, 1  ;;  %v3658_v15 = vshrl.u32 %v3649_v10, 16  ;;  %v234_v16 = vld [vmem:[%s4710_s1] sm:$0x3]  ;;  %v296_v19 = vrot.slane %v294_v12, 1  ;;  %v948_v21 = vrot.slane %v294_v12, 2 }
  0x29   : > { %v947_v20 = vrot.slane %v298_v13, 1  ;;  %v951_v23 = vrot.slane %v3655_v14, 2  ;;  %v2498_v24 = vld [vmem:[%s4710_s1 + $0xa] sm:$0x3]  ;;  %v518_v27 = vsel %vm390_vm0, %v234_v16, 0  ;;  %v3678_v30 = vshll.u32 %v3664_v17, 16 }
  0x2a   : > { %v292_v18 = vor.u32 %v291_v11, %v287_v8  ;;  %v950_v22 = vrot.slane %v3658_v15, 1  ;;  %v3681_v31 = vshrl.u32 %v3664_v17, 16  ;;  %v1199_v32 = vsel %vm390_vm0, %v2498_v24, 0  ;;  %v3707_v45 = vld [vmem:[%s3611_s11 + $0x28] sm:$0xff]   ;;  %v3728_v55 = vld [vmem:[%s3611_s11 + $0x30] sm:$0xff]   ;;  %s2540_s6 = sshll.u32 %s3493_s16, 4 }
  0x2b   : > { %v949_v26 = vor.u32 %v948_v21, %v947_v20  ;;  %v300_v33 = vor.u32 %v298_v13, %v296_v19  ;;  %v304_v34 = vrot.slane %v3655_v14, 1  ;;  %v955_v37 = vrot.slane %v3678_v30, 2  ;;  %v3766_v13 = vld [vmem:[%s3611_s11 + $0x38] sm:$0xff]   ;;  %v230_v16 = vld [vmem:[%s3611_s11 + $0x4c] sm:$0xf]  ;;  %s2314_s7 = sshll.u32 %s3614_s20, 4  ;;  %s4624_s26 = scalar_lea.hbm %s4711_s2, %s2540_s6  ;;  %s4626_s7 = int_to_ptr.vmem [resolvable:$true] %s2314_s7 }
  0x2c   : > { %v297_v25 = vsel %vm285_vm2, %v292_v18, %v296_v19  ;;  %v952_v29 = vor.u32 %v951_v23, %v950_v22  ;;  %v954_v36 = vrot.slane %v3681_v31, 1  ;;  %v3695_v39 = vshll.u32 %v3674_v28, 16  ;;  %v229_v18 = vld [vmem:[%s3611_s11 + $0x48] sm:$0xf]  ;;  %v3782_v24 = vld [vmem:[%s3611_s11 + $0x50] sm:$0xf]  ;;  %s4632_s30 = scalar_lea.hbm %s4712_s3, %s2540_s6 }
  0x2d   : > { %2637 = vmatmul.mubr.msk.bf16.vlgmr.msra.gmra.mrb[0].mxu1 %vm362_vm4, %v297_v25  ;;  %v3698_v40 = vshrl.u32 %v3674_v28, 16  ;;  %v305_v41 = vsel %vm285_vm2, %v300_v33, %v304_v34  ;;  %v308_v46 = vor.u32 %v3658_v15, %v304_v34  ;;  %v312_v47 = vrot.slane %v3678_v30, 1  ;;  %v232_v25 = vld [vmem:[%s3611_s11 + $0x54] sm:$0xf]  ;;  %s2327_s8 = sshll.u32 %s3617_s21, 4  ;;  %s2298_s4 = scalar_lea.sflag [#allocation3], %s3602_s29  ;;  %s4634_s8 = int_to_ptr.vmem [resolvable:$true] %s2327_s8 }
  0x2e   : > { %2640 = vmatprep.mubr.msk.bf16.mxu1 %vm3509_vm1, %v3508_v3  ;;  %2673 = vmatpush3.bf16.msra.mxu1 %v518_v27  ;;  %v953_v35 = vsel %vm946_vm3, %v949_v26, %v952_v29  ;;  %v956_v38 = vor.u32 %v955_v37, %v954_v36  ;;  %v959_v44 = vrot.slane %v3695_v39, 2  ;;  %v3717_v49 = vshll.u32 %v3707_v45, 16  ;;  %v2508_v26 = vld [vmem:[%s4710_s1 + $0xc] sm:$0x3]  ;;  %v3803_v37 = vld [vmem:[%s3611_s11 + $0x40] sm:$0xff]   ;;  %s3379_s15 = scalar_lea.vmem %s4626_s7, 16 }
  0x2f   : > { %2710 = vmatprep.subr.bf16.mxu1 %v3508_v3  ;;  %2789 = vmatmul.mubr.msk.bf16.vlgmr.msra.gmra.mrb[0].mxu0 %vm362_vm4, %v953_v35  ;;  %v958_v43 = vrot.slane %v3698_v40, 1  ;;  %v3720_v50 = vshrl.u32 %v3707_v45, 16  ;;  %v313_v51 = vsel %vm285_vm2, %v308_v46, %v312_v47  ;;  %v316_v56 = vor.u32 %v3681_v31, %v312_v47  ;;  %p3380_p1 = scmp.ne.s32.totalorder %s4626_s7, %s3379_s15 }
  0x30   : > { %2825 = vmatpush3.bf16.msra.mxu0 %v1199_v32  ;;  %2792 = vmatprep.mubr.msk.bf16.mxu0 %vm3509_vm1, %v3508_v3  ;;  %v957_v42 = vsel %vm946_vm3, %v952_v29, %v956_v38  ;;  %v963_v54 = vrot.slane %v3717_v49, 2  ;;  %v320_v57 = vrot.slane %v3695_v39, 1  ;;  %v3738_v59 = vshll.u32 %v3728_v55, 16 }
  0x31   : > { %2862 = vmatprep.subr.bf16.mxu0 %v3508_v3  ;;  %v960_v48 = vor.u32 %v959_v44, %v958_v43  ;;  %v962_v53 = vrot.slane %v3720_v50, 1  ;;  %v3741_v60 = vshrl.u32 %v3728_v55, 16  ;;  %v328_v2 = vrot.slane %v3717_v49, 1  ;;  %p3381_p2 = pnand %p3380_p1, %p3581_p3 }
  0x32   : > { %v321_v61 = vsel %vm285_vm2, %v316_v56, %v320_v57  ;;  %v967_v0 = vrot.slane %v3738_v59, 2  ;;  %v324_v1 = vor.u32 %v3698_v40, %v320_v57  ;;  %v336_v12 = vrot.slane %v3738_v59, 1 }
  0x33   : > { %v961_v52 = vsel %vm946_vm3, %v956_v38, %v960_v48  ;;  %v964_v58 = vor.u32 %v963_v54, %v962_v53  ;;  %v966_v63 = vrot.slane %v3741_v60, 1  ;;  %v332_v11 = vor.u32 %v3720_v50, %v328_v2  ;;  %p3382_p4 = pneg %p3381_p2 }
  0x34   : > { %v329_v8 = vsel %vm285_vm2, %v324_v1, %v328_v2  ;;  %v1152_v19 = vrot.slane %v3643_v7, 2  ;;  %v1153_v20 = vrot.slane %v3649_v10, 2  ;;  %v3775_v21 = vcombine.low %v229_v18, %v230_v16 }
  0x35   : > { %2641 = vmatmul.mubr.msk.bf16.gmra.mrb[4].mxu1 %vm362_vm4, %v305_v41  ;;  %v965_v62 = vsel %vm946_vm3, %v960_v48, %v964_v58  ;;  %v3755_v5 = vor.u32 %v967_v0, %v966_v63  ;;  %v337_v22 = vsel %vm285_vm2, %v332_v11, %v336_v12  ;;  %vm1151_vm5 = vcmask 1045504  }
  0x36   : > { %2644 = vmatprep.mubr.msk.bf16.mxu1 %vm3509_vm1, %v3508_v3  ;;  %v3779_v23 = vshll.u32 %v3766_v13, 16  ;;  %v3789_v27 = vcombine.low %v3782_v24, %v232_v25  ;;  %v1154_v29 = vsel %vm1151_vm5, %v1152_v19, %v1153_v20  ;;  %v3794_v32 = vrot.slane %v3775_v21, 2 }
  0x37   : > { %2793 = vmatmul.mubr.msk.bf16.gmra.mrb[4].mxu0 %vm362_vm4, %v957_v42  ;;  %v969_v9 = vsel %vm946_vm3, %v964_v58, %v3755_v5  ;;  %v1343_v34 = vsel %vm390_vm0, %v2508_v26, 0  ;;  %v340_v35 = vor.u32 %v3741_v60, %v336_v12  ;;  %v1155_v41 = vrot.slane %v3664_v17, 2 }
  0x38   : > { %2796 = vmatprep.mubr.msk.bf16.mxu0 %vm3509_vm1, %v3508_v3  ;;  %v1332_v33 = vrot.slane %v3789_v27, 2  ;;  %v344_v36 = vrot.slane %v3779_v23, 1  ;;  %v3817_v43 = vshrl.u32 %v3766_v13, 16  ;;  %v3820_v44 = vshll.u32 %v3803_v37, 16 }
  0x39   : > { %v3825_v46 = vsel %vm1151_vm5, %v1153_v20, %v1155_v41  ;;  %v3840_v54 = vshrl.u32 %v3803_v37, 16  ;;  %v1471_v57 = vrot.slane %v3658_v15, 2  ;;  %v1472_v58 = vrot.slane %v3655_v14, 3 }
  0x3a   : > { %v3809_v38 = vsel %vm1151_vm5, %v3794_v32, %v1332_v33  ;;  %v345_v42 = vsel %vm285_vm2, %v340_v35, %v344_v36  ;;  %v348_v47 = vor.u32 %v3817_v43, %v344_v36  ;;  %v352_v48 = vrot.slane %v3820_v44, 1 }
  0x3b   : > { %vm1470_vm6 = vsmask.f32 5376  ;;  %v1473_v0 = vor.u32 %v1472_v58, %v1471_v57  ;;  %v1163_v20 = vrot.slane %v3766_v13, 2  ;;  %v1165_v25 = vrot.slane %v3803_v37, 2  ;;  %v4011_v58 = vld [vmem:[%s3611_s11 + $0x58] ss:$0 sps:$4 sm:$0xff]  }
  0x3c   : > { %v353_v53 = vsel %vm285_vm2, %v348_v47, %v352_v48  ;;  %v356_v1 = vor.u32 %v3840_v54, %v352_v48  ;;  %vm627_vm7 = vcmask 1046528   ;;  %vm1675_vm8 = vcmask 1044480   ;;  %s3510_s11 = smov [#allocation2]  }
  0x3d   : > { %2645 = vmatmul.mubr.msk.bf16.gmra.mrb[8].mxu1 %vm362_vm4, %v313_v51  ;;  %v3831_v51 = vcombine.low %v229_v18, %v229_v18  ;;  %v1166_v26 = vsel %vm1151_vm5, %v1163_v20, %v1165_v25  ;;  %s3383_s5 = sshll.u32 %s3510_s11, 4  ;;  %s3384_s5 = int_to_ptr.vmem [resolvable:$false] %s3383_s5 }
  0x3e   : > { %2648 = vmatprep.mubr.msk.bf16.mxu1 %vm3509_vm1, %v3508_v3  ;;  %s3385_s9 = scalar_lea.vmem %s3384_s5, 32  ;;  %p3386_p5 = scmp.lt.s32.totalorder %s4626_s7, %s3384_s5 }
  0x3f   : > { %2797 = vmatmul.mubr.msk.bf16.gmra.mrb[8].mxu0 %vm362_vm4, %v961_v52  ;;  %v1157_v52 = vrot.slane %v3674_v28, 2  ;;  %v358_v56 = vshll.u32 %v3831_v51, 16  ;;  %p3387_p6 = scmp.lt.s32.totalorder %s3385_s9, %s3379_s15 }
  0x40   : > { %2800 = vmatprep.mubr.msk.bf16.mxu0 %vm3509_vm1, %v3508_v3 }
  0x41   : > { %v3849_v63 = vsel %vm1151_vm5, %v1155_v41, %v1157_v52  ;;  %v360_v2 = vrot.slane %v358_v56, 1  ;;  %v635_v56 = vrot.slane %v3674_v28, 1  ;;  %p3388_p7 = por %p3387_p6, %p3386_p5 }
  0x43   : > { %p3389_p8 = pnand %p3388_p7, %p3382_p4 }
  0x45   : > { %2649 = vmatmul.mubr.msk.bf16.gmra.mrb[12].mxu1 %vm362_vm4, %v321_v61  ;;  %v1474_v61 = vrot.slane %v3681_v31, 2  ;;  %v361_v31 = vsel %vm285_vm2, %v356_v1, %v360_v2  ;;  %v2530_v2 = vld [vmem:[%s4710_s1 + $0x10] sm:$0x3] }
  0x46   : > { %2652 = vmatprep.mubr.msk.bf16.mxu1 %vm3509_vm1, %v3508_v3 }
  0x47   : > { %2801 = vmatmul.mubr.msk.bf16.gmra.mrb[12].mxu0 %vm362_vm4, %v965_v62  ;;  %v1475_v62 = vrot.slane %v3678_v30, 3  ;;  %v1159_v30 = vrot.slane %v3707_v45, 2 }
  0x48   : > { %2804 = vmatprep.mubr.msk.bf16.mxu0 %vm3509_vm1, %v3508_v3 }
  0x49   : > { %v1476_v15 = vor.u32 %v1475_v62, %v1474_v61  ;;  %v1160_v11 = vsel %vm1151_vm5, %v1157_v52, %v1159_v30  ;;  %v633_v52 = vrot.slane %v3664_v17, 1  ;;  %v637_v61 = vrot.slane %v3707_v45, 1 }
  0x4a   : > { %v1334_v62 = vrot.slane %v4011_v58, 2 }
  0x4b   : > { %v3857_v14 = vsel %vm1470_vm6, %v1473_v0, %v1476_v15  ;;  %v4006_v57 = vsel %vm627_vm7, %v633_v52, %v635_v56 }
  0x4c   : > { %v1335_v0 = vsel %vm1151_vm5, %v1332_v33, %v1334_v62  ;;  %v1723_v33 = vsel %vm390_vm0, %v2530_v2, 0  ;;  %v1676_v62 = vrot.slane %v3649_v10, 3 }
  0x4d   : > { %2653 = vmatmul.mubr.msk.bf16.gmra.mrb[16].mxu1 %vm362_vm4, %v329_v8  ;;  %v1478_v8 = vrot.slane %v3698_v40, 2  ;;  %v2466_v40 = vld [vmem:[%s4710_s1 + $0x4] sm:$0x3] }
  0x4e   : > { %2656 = vmatprep.mubr.msk.bf16.mxu1 %vm3509_vm1, %v3508_v3  ;;  %v675_v18 = vsel %vm390_vm0, %v2466_v40, 0  ;;  %v1487_v40 = vrot.slane %v3738_v59, 3  ;;  %v1490_v59 = vrot.slane %v3817_v43, 2 }
  0x4f   : > { %2805 = vmatmul.mubr.msk.bf16.gmra.mrb[16].mxu0 %vm362_vm4, %v969_v9  ;;  %v1479_v9 = vrot.slane %v3695_v39, 3  ;;  %v1161_v39 = vrot.slane %v3728_v55, 2 }
  0x50   : > { %2826 = vmatprep.mubr.msk.bf16.mxu0 %vm3509_vm1, %v3508_v3 }
  0x51   : > { %v3867_v12 = vor.u32 %v1479_v9, %v1478_v8  ;;  %v1162_v19 = vsel %vm1151_vm5, %v1159_v30, %v1161_v39  ;;  %v1483_v8 = vrot.slane %v3717_v49, 3  ;;  %v4061_v9 = vrot.slane %v3803_v37, 1 }
  0x53   : > { %v3873_v16 = vsel %vm1470_vm6, %v1476_v15, %v3867_v12  ;;  %v641_v15 = vrot.slane %v3766_v13, 1 }
  0x55   : > { %2657 = vmatmul.mubr.msk.bf16.gmra.mrb[20].mxu1 %vm362_vm4, %v337_v22  ;;  %v1164_v22 = vsel %vm1151_vm5, %v1161_v39, %v1163_v20  ;;  %v1494_v20 = vrot.slane %v3840_v54, 2 }
  0x56   : > { %2660 = vmatprep.mubr.msk.bf16.mxu1 %vm3509_vm1, %v3508_v3 }
  0x57   : > { %2827 = vmatmul.mubr.msk.bf16.vlgmr.msra.gmra.mrb[0].mxu0 %vm362_vm4, %v1154_v29  ;;  %v1168_v29 = vsel %vm1151_vm5, %v1165_v25, %v3794_v32 }
  0x58   : > { %2863 = vmatpush3.bf16.msra.mxu0 %v1343_v34  ;;  %2830 = vmatprep.mubr.msk.bf16.mxu0 %vm3509_vm1, %v3508_v3  ;;  %v3916_v34 = vcombine.low %v3782_v24, %v3782_v24  ;;  %v2520_v24 = vld [vmem:[%s4710_s1 + $0xe] sm:$0x3] }
  0x59   : > { %2900 = vmatprep.subr.bf16.mxu0 %v3508_v3  ;;  %v1548_v41 = vsel %vm390_vm0, %v2520_v24, 0 }
  0x5a   : > { %v1169_v35 = vrot.slane %v3916_v34, 2 }
  0x5c   : > { %v1170_v36 = vsel %vm1151_vm5, %v3794_v32, %v1169_v35  ;;  %v628_v32 = vrot.slane %v3635_v6, 1 }
  0x5d   : > { %2661 = vmatmul.mubr.msk.bf16.gmra.mrb[24].mxu1 %vm362_vm4, %v345_v42  ;;  %v629_v42 = vrot.slane %v3643_v7, 1 }
  0x5e   : > { %2664 = vmatprep.mubr.msk.bf16.mxu1 %vm3509_vm1, %v3508_v3 }
  0x5f   : > { %2831 = vmatmul.mubr.msk.bf16.gmra.mrb[4].mxu0 %vm362_vm4, %v3825_v46  ;;  %v630_v47 = vsel %vm627_vm7, %v628_v32, %v629_v42  ;;  %v1506_v32 = vshll.u32 %v3789_v27, 16 }
  0x60   : > { %2834 = vmatprep.mubr.msk.bf16.mxu0 %vm3509_vm1, %v3508_v3 }
  0x65   : > { %2665 = vmatmul.mubr.msk.bf16.gmra.mrb[28].mxu1 %vm362_vm4, %v353_v53 }
  0x66   : > { %2668 = vmatprep.mubr.msk.bf16.mxu1 %vm3509_vm1, %v3508_v3 }
  0x67   : > { %2835 = vmatmul.mubr.msk.bf16.gmra.mrb[8].mxu0 %vm362_vm4, %v3849_v63 }
  0x68   : > { %2838 = vmatprep.mubr.msk.bf16.mxu0 %vm3509_vm1, %v3508_v3 }
  0x6d   : > { %2669 = vmatmul.mubr.msk.bf16.gmra.mrb[32].mxu1 %vm362_vm4, %v361_v31  ;;  %v1482_v31 = vrot.slane %v3720_v50, 2  ;;  %v1486_v50 = vrot.slane %v3741_v60, 2 }
  0x6e   : > { %2674 = vmatprep.mubr.msk.bf16.mxu1 %vm3509_vm1, %v3508_v3 }
  0x6f   : > { %2839 = vmatmul.mubr.msk.bf16.gmra.mrb[12].mxu0 %vm362_vm4, %v1160_v11  ;;  %v1488_v39 = vor.u32 %v1487_v40, %v1486_v50 }
  0x70   : > { %2842 = vmatprep.mubr.msk.bf16.mxu0 %vm3509_vm1, %v3508_v3 }
  0x75   : > { %2675 = vmatmul.mubr.msk.bf16.vlgmr.msra.gmra.mrb[0].mxu1 %vm362_vm4, %v3635_v6  ;;  %v631_v6 = vrot.slane %v3649_v10, 1 }
  0x76   : > { %2678 = vmatprep.mubr.msk.bf16.mxu1 %vm3509_vm1, %v3508_v3  ;;  %2711 = vmatpush3.bf16.msra.mxu1 %v675_v18 }
  0x77   : > { %2748 = vmatprep.subr.bf16.mxu1 %v3508_v3  ;;  %2843 = vmatmul.mubr.msk.bf16.gmra.mrb[16].mxu0 %vm362_vm4, %v1162_v19  ;;  %v3995_v53 = vsel %vm627_vm7, %v631_v6, %v633_v52 }
  0x78   : > { %2846 = vmatprep.mubr.msk.bf16.mxu0 %vm3509_vm1, %v3508_v3 }
  0x7d   : > { %2679 = vmatmul.mubr.msk.bf16.gmra.mrb[4].mxu1 %vm362_vm4, %v3643_v7  ;;  %v3984_v7 = vsel %vm627_vm7, %v629_v42, %v631_v6  ;;  %v1512_v6 = vshrl.u32 %v4011_v58, 16 }
  0x7e   : > { %2682 = vmatprep.mubr.msk.bf16.mxu1 %vm3509_vm1, %v3508_v3 }
  0x7f   : > { %2847 = vmatmul.mubr.msk.bf16.gmra.mrb[20].mxu0 %vm362_vm4, %v1164_v22 }
  0x80   : > { %2850 = vmatprep.mubr.msk.bf16.mxu0 %vm3509_vm1, %v3508_v3 }
  0x85   : > { %2683 = vmatmul.mubr.msk.bf16.gmra.mrb[8].mxu1 %vm362_vm4, %v3649_v10 }
  0x86   : > { %2686 = vmatprep.mubr.msk.bf16.mxu1 %vm3509_vm1, %v3508_v3 }
  0x87   : > { %2851 = vmatmul.mubr.msk.bf16.gmra.mrb[24].mxu0 %vm362_vm4, %v1166_v26 }
  0x88   : > { %2854 = vmatprep.mubr.msk.bf16.mxu0 %vm3509_vm1, %v3508_v3 }
  0x8d   : > { %2687 = vmatmul.mubr.msk.bf16.gmra.mrb[12].mxu1 %vm362_vm4, %v3664_v17 }
  0x8e   : > { %2690 = vmatprep.mubr.msk.bf16.mxu1 %vm3509_vm1, %v3508_v3 }
  0x8f   : > { %2855 = vmatmul.mubr.msk.bf16.gmra.mrb[28].mxu0 %vm362_vm4, %v1168_v29 }
  0x90   : > { %2858 = vmatprep.mubr.msk.bf16.mxu0 %vm3509_vm1, %v3508_v3 }
  0x95   : > { %2691 = vmatmul.mubr.msk.bf16.gmra.mrb[16].mxu1 %vm362_vm4, %v3674_v28 }
  0x96   : > { %2694 = vmatprep.mubr.msk.bf16.mxu1 %vm3509_vm1, %v3508_v3 }
  0x97   : > { %2859 = vmatmul.mubr.msk.bf16.gmra.mrb[32].mxu0 %vm362_vm4, %v1170_v36 }
  0x98   : > { %2864 = vmatprep.mubr.msk.bf16.mxu0 %vm3509_vm1, %v3508_v3 }
  0x9d   : > { %2695 = vmatmul.mubr.msk.bf16.gmra.mrb[20].mxu1 %vm362_vm4, %v3707_v45 }
  0x9e   : > { %2698 = vmatprep.mubr.msk.bf16.mxu1 %vm3509_vm1, %v3508_v3 }
  0x9f   : > { %2865 = vmatmul.mubr.msk.bf16.vlgmr.msra.gmra.mrb[0].mxu0 %vm362_vm4, %v3825_v46  ;;  %v2476_v46 = vld [vmem:[%s4710_s1 + $0x6] sm:$0x3] }
  0xa0   : > { %2901 = vmatpush3.bf16.msra.mxu0 %v1548_v41  ;;  %2868 = vmatprep.mubr.msk.bf16.mxu0 %vm3509_vm1, %v3508_v3  ;;  %v819_v48 = vsel %vm390_vm0, %v2476_v46, 0  ;;  %v1503_v41 = vshrl.u32 %v3789_v27, 16 }
  0xa1   : > { %2938 = vmatprep.subr.bf16.mxu0 %v3508_v3 }
  0xa2   : > { %v1505_v46 = vrot.slane %v1503_v41, 2 }
  0xa5   : > { %2699 = vmatmul.mubr.msk.bf16.gmra.mrb[24].mxu1 %vm362_vm4, %v3728_v55 }
  0xa6   : > { %2702 = vmatprep.mubr.msk.bf16.mxu1 %vm3509_vm1, %v3508_v3 }
  0xa7   : > { %2869 = vmatmul.mubr.msk.bf16.gmra.mrb[4].mxu0 %vm362_vm4, %v3849_v63  ;;  %v4022_v63 = vsel %vm627_vm7, %v635_v56, %v637_v61 }
  0xa8   : > { %2872 = vmatprep.mubr.msk.bf16.mxu0 %vm3509_vm1, %v3508_v3 }
  0xad   : > { %2703 = vmatmul.mubr.msk.bf16.gmra.mrb[28].mxu1 %vm362_vm4, %v3766_v13 }
  0xae   : > { %2706 = vmatprep.mubr.msk.bf16.mxu1 %vm3509_vm1, %v3508_v3 }
  0xaf   : > { %2873 = vmatmul.mubr.msk.bf16.gmra.mrb[8].mxu0 %vm362_vm4, %v1160_v11  ;;  %v4069_v11 = vsel %vm627_vm7, %v641_v15, %v4061_v9 }
  0xb0   : > { %2876 = vmatprep.mubr.msk.bf16.mxu0 %vm3509_vm1, %v3508_v3 }
  0xb5   : > { %2707 = vmatmul.mubr.msk.bf16.gmra.mrb[32].mxu1 %vm362_vm4, %v3803_v37 }
  0xb6   : > { %2712 = vmatprep.mubr.msk.bf16.mxu1 %vm3509_vm1, %v3508_v3 }
  0xb7   : > { %2877 = vmatmul.mubr.msk.bf16.gmra.mrb[12].mxu0 %vm362_vm4, %v1162_v19 }
  0xb8   : > { %2880 = vmatprep.mubr.msk.bf16.mxu0 %vm3509_vm1, %v3508_v3 }
  0xbd   : > { %2713 = vmatmul.mubr.msk.bf16.vlgmr.msra.gmra.mrb[0].mxu1 %vm362_vm4, %v630_v47  ;;  %v1508_v47 = vrot.slane %v1506_v32, 3 }
  0xbe   : > { %2716 = vmatprep.mubr.msk.bf16.mxu1 %vm3509_vm1, %v3508_v3  ;;  %2749 = vmatpush3.bf16.msra.mxu1 %v819_v48 }
  0xbf   : > { %2976 = vmatprep.subr.bf16.mxu1 %v3508_v3  ;;  %2881 = vmatmul.mubr.msk.bf16.gmra.mrb[16].mxu0 %vm362_vm4, %v1164_v22  ;;  %v1495_v22 = vrot.slane %v3820_v44, 3  ;;  %v1509_v48 = vor.u32 %v1508_v47, %v1505_v46 }
  0xc0   : > { %2884 = vmatprep.mubr.msk.bf16.mxu0 %vm3509_vm1, %v3508_v3 }
  0xc1   : > { %v1496_v25 = vor.u32 %v1495_v22, %v1494_v20  ;;  %v1693_v20 = vrot.slane %v4011_v58, 3 }
  0xc5   : > { %2717 = vmatmul.mubr.msk.bf16.gmra.mrb[4].mxu1 %vm362_vm4, %v3984_v7 }
  0xc6   : > { %2720 = vmatprep.mubr.msk.bf16.mxu1 %vm3509_vm1, %v3508_v3 }
  0xc7   : > { %2885 = vmatmul.mubr.msk.bf16.gmra.mrb[20].mxu0 %vm362_vm4, %v1166_v26  ;;  %v979_v26 = vshrl.u32 %v3775_v21, 16 }
  0xc8   : > { %2888 = vmatprep.mubr.msk.bf16.mxu0 %vm3509_vm1, %v3508_v3 }
  0xc9   : > { %v1498_v36 = vrot.slane %v979_v26, 2 }
  0xcd   : > { %2721 = vmatmul.mubr.msk.bf16.gmra.mrb[8].mxu1 %vm362_vm4, %v3995_v53 }
  0xce   : > { %2724 = vmatprep.mubr.msk.bf16.mxu1 %vm3509_vm1, %v3508_v3 }
  0xcf   : > { %2889 = vmatmul.mubr.msk.bf16.gmra.mrb[24].mxu0 %vm362_vm4, %v1168_v29  ;;  %v982_v29 = vshll.u32 %v3775_v21, 16 }
  0xd0   : > { %2892 = vmatprep.mubr.msk.bf16.mxu0 %vm3509_vm1, %v3508_v3 }
  0xd5   : > { %2725 = vmatmul.mubr.msk.bf16.gmra.mrb[12].mxu1 %vm362_vm4, %v4006_v57 }
  0xd6   : > { %2728 = vmatprep.mubr.msk.bf16.mxu1 %vm3509_vm1, %v3508_v3 }
  0xd7   : > { %2893 = vmatmul.mubr.msk.bf16.gmra.mrb[28].mxu0 %vm362_vm4, %v3809_v38  ;;  %v639_v38 = vrot.slane %v3728_v55, 1 }
  0xd8   : > { %2896 = vmatprep.mubr.msk.bf16.mxu0 %vm3509_vm1, %v3508_v3 }
  0xd9   : > { %v4036_v1 = vsel %vm627_vm7, %v637_v61, %v639_v38  ;;  %v4052_v30 = vsel %vm627_vm7, %v639_v38, %v641_v15  ;;  %v1679_v38 = vrot.slane %v3674_v28, 3  ;;  %v1683_v15 = vrot.slane %v3728_v55, 3 }
  0xda   : > { %v1685_v55 = vrot.slane %v3766_v13, 3  ;;  %v1687_v13 = vrot.slane %v3803_v37, 3  ;;  %v991_v37 = vshll.u32 %v3916_v34, 16 }
  0xdc   : > { %v1688_v50 = vsel %vm1675_vm8, %v1685_v55, %v1687_v13 }
  0xdd   : > { %2729 = vmatmul.mubr.msk.bf16.gmra.mrb[16].mxu1 %vm362_vm4, %v4022_v63 }
  0xde   : > { %2732 = vmatprep.mubr.msk.bf16.mxu1 %vm3509_vm1, %v3508_v3 }
  0xdf   : > { %2897 = vmatmul.mubr.msk.bf16.gmra.mrb[32].mxu0 %vm362_vm4, %v1335_v0 }
  0xe0   : > { %2902 = vmatprep.mubr.msk.bf16.mxu0 %vm3509_vm1, %v3508_v3 }
  0xe5   : > { %2733 = vmatmul.mubr.msk.bf16.gmra.mrb[20].mxu1 %vm362_vm4, %v4036_v1 }
  0xe6   : > { %2736 = vmatprep.mubr.msk.bf16.mxu1 %vm3509_vm1, %v3508_v3 }
  0xe7   : > { %2903 = vmatmul.mubr.msk.bf16.vlgmr.msra.gmra.mrb[0].mxu0 %vm362_vm4, %v3857_v14  ;;  %v1484_v14 = vor.u32 %v1483_v8, %v1482_v31  ;;  %v971_v31 = vrot.slane %v3779_v23, 2 }
  0xe8   : > { %2939 = vmatpush3.bf16.msra.mxu0 %v1723_v33  ;;  %2906 = vmatprep.mubr.msk.bf16.mxu0 %vm3509_vm1, %v3508_v3  ;;  %v810_v33 = vrot.slane %v3916_v34, 1 }
  0xe9   : > { %v1485_v49 = vsel %vm1470_vm6, %v3867_v12, %v1484_v14  ;;  %v1489_v60 = vsel %vm1470_vm6, %v1484_v14, %v1488_v39  ;;  %v1491_v12 = vrot.slane %v3779_v23, 3  ;;  %v974_v23 = vrot.slane %v3840_v54, 1 }
  0xea   : > { %v975_v14 = vrot.slane %v3820_v44, 2  ;;  %v981_v44 = vrot.slane %v979_v26, 1  ;;  %v984_v54 = vrot.slane %v982_v29, 2 }
  0xec   : > { %v985_v40 = vor.u32 %v984_v54, %v981_v44 }
  0xed   : > { %2737 = vmatmul.mubr.msk.bf16.gmra.mrb[24].mxu1 %vm362_vm4, %v4052_v30 }
  0xee   : > { %2740 = vmatprep.mubr.msk.bf16.mxu1 %vm3509_vm1, %v3508_v3 }
  0xef   : > { %2907 = vmatmul.mubr.msk.bf16.gmra.mrb[4].mxu0 %vm362_vm4, %v3873_v16  ;;  %v645_v16 = vrot.slane %v3831_v51, 1  ;;  %v1492_v51 = vor.u32 %v1491_v12, %v1490_v59  ;;  %v993_v59 = vrot.slane %v991_v37, 2 }
  0xf0   : > { %2910 = vmatprep.mubr.msk.bf16.mxu0 %vm3509_vm1, %v3508_v3 }
  0xf1   : > { %v646_v18 = vsel %vm627_vm7, %v4061_v9, %v645_v16  ;;  %v1493_v19 = vsel %vm1470_vm6, %v1488_v39, %v1492_v51  ;;  %v1497_v35 = vsel %vm1470_vm6, %v1492_v51, %v1496_v25  ;;  %v988_v16 = vshrl.u32 %v3916_v34, 16 }
  0xf2   : > { %v1689_v39 = vrot.slane %v3775_v21, 3  ;;  %v1691_v34 = vrot.slane %v3789_v27, 3  ;;  %v1848_v27 = vlaneseq }
  0xf4   : > { %v1690_v12 = vsel %vm1675_vm8, %v1687_v13, %v1689_v39  ;;  %v1694_v22 = vsel %vm1675_vm8, %v1691_v34, %v1693_v20 }
  0xf5   : > { %2741 = vmatmul.mubr.msk.bf16.gmra.mrb[28].mxu1 %vm362_vm4, %v4069_v11 }
  0xf6   : > { %2744 = vmatprep.mubr.msk.bf16.mxu1 %vm3509_vm1, %v3508_v3 }
  0xf7   : > { %2911 = vmatmul.mubr.msk.bf16.gmra.mrb[8].mxu0 %vm362_vm4, %v1485_v49  ;;  %v976_v49 = vor.u32 %v975_v14, %v974_v23 }
  0xf8   : > { %2914 = vmatprep.mubr.msk.bf16.mxu0 %vm3509_vm1, %v3508_v3 }
  0xfd   : > { %2745 = vmatmul.mubr.msk.bf16.gmra.mrb[32].mxu1 %vm362_vm4, %v646_v18  ;;  %v986_v18 = vsel %vm946_vm3, %v976_v49, %v985_v40 }
  0xfe   : > { %2750 = vmatprep.mubr.msk.bf16.mxu1 %vm3509_vm1, %v3508_v3 }
  0xff   : > { %2915 = vmatmul.mubr.msk.bf16.gmra.mrb[12].mxu0 %vm362_vm4, %v1489_v60  ;;  %v990_v60 = vrot.slane %v988_v16, 1 }
 0x100   : > { %2918 = vmatprep.mubr.msk.bf16.mxu0 %vm3509_vm1, %v3508_v3 }
 0x101   : > { %v994_v51 = vor.u32 %v993_v59, %v990_v60 }
 0x105   : > { %2751 = vmatmul.mubr.msk.bf16.vlgmr.msra.gmra.mrb[0].mxu1 %vm362_vm4, %v3984_v7  ;;  %v1515_v7 = vshll.u32 %v4011_v58, 16 }
 0x106   : > { %2754 = vmatprep.mubr.msk.bf16.mxu1 %vm3509_vm1, %v3508_v3  ;;  %2977 = vmatpush3.bf16.msra.mxu1 %v3631_v4  ;;  %v1499_v4 = vrot.slane %v982_v29, 3 }
 0x107   : > { %2919 = vmatmul.mubr.msk.bf16.gmra.mrb[16].mxu0 %vm362_vm4, %v1493_v19  ;;  %v1517_v56 = vrot.slane %v1515_v7, 3  ;;  %v1692_v19 = vsel %vm1675_vm8, %v1689_v39, %v1691_v34 }
 0x108   : > { %2922 = vmatprep.mubr.msk.bf16.mxu0 %vm3509_vm1, %v3508_v3  ;;  %v1500_v24 = vor.u32 %v1499_v4, %v1498_v36  ;;  %v4239_v36 = vshrl.u32 %v1848_v27, 7 }
 0x10a   : > { %v1501_v42 = vsel %vm1470_vm6, %v1496_v25, %v1500_v24  ;;  %v1510_v52 = vsel %vm1470_vm6, %v1500_v24, %v1509_v48  ;;  %v1850_v24 = vadd.s32 8, %v4239_v36  ;;  %v1851_v7 = vadd.s32 16, %v4239_v36 }
 0x10b   : > { %v4282_v14 = vadd.s32 48, %v4239_v36  ;;  %v4307_v34 = vadd.s32 64, %v4239_v36 }
 0x10c   : > { %v4250_v46 = vmul.u32.u64.low 3817748708, %v1850_v24  ;;  %v4251_v47 = vmul.u32.u64.high 3817748708, %v1850_v24, %v4250_v46 }
 0x10d   : > { %2755 = vmatmul.mubr.msk.bf16.gmra.mrb[4].mxu1 %vm362_vm4, %v3995_v53  ;;  %v1514_v53 = vrot.slane %v1512_v6, 2  ;;  %v4288_v44 = vmul.u32.u64.low 3817748708, %v4282_v14  ;;  %v4289_v54 = vmul.u32.u64.high 3817748708, %v4282_v14, %v4288_v44 }
 0x10e   : > { %2758 = vmatprep.mubr.msk.bf16.mxu1 %vm3509_vm1, %v3508_v3 }
 0x10f   : > { %2923 = vmatmul.mubr.msk.bf16.gmra.mrb[20].mxu0 %vm362_vm4, %v1497_v35 }
 0x110   : > { %2926 = vmatprep.mubr.msk.bf16.mxu0 %vm3509_vm1, %v3508_v3 }
 0x115   : > { %2759 = vmatmul.mubr.msk.bf16.gmra.mrb[8].mxu1 %vm362_vm4, %v4006_v57  ;;  %v1518_v57 = vor.u32 %v1517_v56, %v1514_v53 }
 0x116   : > { %2762 = vmatprep.mubr.msk.bf16.mxu1 %vm3509_vm1, %v3508_v3 }
 0x117   : > { %2927 = vmatmul.mubr.msk.bf16.gmra.mrb[24].mxu0 %vm362_vm4, %v1501_v42  ;;  %v1519_v61 = vsel %vm1470_vm6, %v1509_v48, %v1518_v57  ;;  %v4247_v32 = vmul.u32.u64.low 3817748708, %v4239_v36  ;;  %v4248_v42 = vmul.u32.u64.high 3817748708, %v4239_v36, %v4247_v32  ;;  %v1884_v57 = vshrl.u32 %v4251_v47, 4 }
 0x118   : > { %2930 = vmatprep.mubr.msk.bf16.mxu0 %vm3509_vm1, %v3508_v3  ;;  %v1939_v32 = vshrl.u32 %v4289_v54, 4 }
 0x119   : > { %v1873_v56 = vshrl.u32 %v4248_v42, 4  ;;  %v4323_v42 = vadd.s32 72, %v4239_v36 }
 0x11d   : > { %2763 = vmatmul.mubr.msk.bf16.gmra.mrb[12].mxu1 %vm362_vm4, %v4022_v63  ;;  %v1677_v63 = vrot.slane %v3664_v17, 3  ;;  %v808_v17 = vrot.slane %v3775_v21, 1  ;;  %v995_v21 = vsel %vm946_vm3, %v985_v40, %v994_v51  ;;  %v4294_v40 = vadd.s32 56, %v4239_v36 }
 0x11e   : > { %2766 = vmatprep.mubr.msk.bf16.mxu1 %vm3509_vm1, %v3508_v3 }
 0x11f   : > { %2931 = vmatmul.mubr.msk.bf16.gmra.mrb[28].mxu0 %vm362_vm4, %v1510_v52  ;;  %v1678_v0 = vsel %vm1675_vm8, %v1676_v62, %v1677_v63  ;;  %v1680_v10 = vsel %vm1675_vm8, %v1677_v63, %v1679_v38  ;;  %v809_v28 = vsel %vm627_vm7, %v4061_v9, %v808_v17 }
 0x120   : > { %2934 = vmatprep.mubr.msk.bf16.mxu0 %vm3509_vm1, %v3508_v3  ;;  %v4261_v62 = vmul.u32.u64.low 3817748708, %v1851_v7  ;;  %v4262_v63 = vmul.u32.u64.high 3817748708, %v1851_v7, %v4261_v62 }
 0x122   : > { %v1895_v23 = vshrl.u32 %v4262_v63, 4 }
 0x125   : > { %2767 = vmatmul.mubr.msk.bf16.gmra.mrb[16].mxu1 %vm362_vm4, %v4036_v1  ;;  %v1681_v1 = vrot.slane %v3707_v45, 3  ;;  %v811_v45 = vsel %vm627_vm7, %v808_v17, %v810_v33  ;;  %v1885_v17 = vmul.u32 18, %v1884_v57 }
 0x126   : > { %2770 = vmatprep.mubr.msk.bf16.mxu1 %vm3509_vm1, %v3508_v3 }
 0x127   : > { %2935 = vmatmul.mubr.msk.bf16.gmra.mrb[32].mxu0 %vm362_vm4, %v1519_v61  ;;  %v1682_v2 = vsel %vm1675_vm8, %v1679_v38, %v1681_v1  ;;  %v1684_v8 = vsel %vm1675_vm8, %v1681_v1, %v1683_v15  ;;  %v1852_v61 = vadd.s32 24, %v4239_v36  ;;  %v1853_v38 = vadd.s32 32, %v4239_v36 }
 0x128   : > { %2940 = vmatprep.mubr.msk.bf16.mxu0 %vm3509_vm1, %v3508_v3 }
 0x12d   : > { %2771 = vmatmul.mubr.msk.bf16.gmra.mrb[20].mxu1 %vm362_vm4, %v4052_v30  ;;  %v970_v30 = vrot.slane %v3817_v43, 1 }
 0x12e   : > { %2774 = vmatprep.mubr.msk.bf16.mxu1 %vm3509_vm1, %v3508_v3 }
 0x12f   : > { %2941 = vmatmul.mubr.msk.bf16.vlgmr.msra.gmra.mrb[0].mxu0 %vm362_vm4, %v1678_v0  ;;  %v972_v9 = vor.u32 %v971_v31, %v970_v30  ;;  %v1874_v0 = vmul.u32 18, %v1873_v56  ;;  %v4273_v30 = vmul.u32.u64.low 3817748708, %v1853_v38  ;;  %v4274_v31 = vmul.u32.u64.high 3817748708, %v1853_v38, %v4273_v30 }
 0x130   : > { %2944 = vmatprep.mubr.msk.bf16.mxu0 %vm3509_vm1, %v3508_v3 }
 0x131   : > { %v973_v43 = vsel %vm946_vm3, %v3755_v5, %v972_v9  ;;  %v977_v5 = vsel %vm946_vm3, %v972_v9, %v976_v49  ;;  %v1886_v9 = vsub.s32 %v1850_v24, %v1885_v17  ;;  %v1917_v60 = vshrl.u32 %v4274_v31, 4 }
 0x133   : > { %vm2066_vm11 = vcmp.ne.s32.totalorder %v1886_v9, 0  ;;  %vm2084_vm12 = vcmp.lt.s32.totalorder %v1886_v9, 0 }
 0x134   : > { %vm4301_vm14 = vmand %vm2084_vm12, %vm2066_vm11 }
 0x135   : > { %2775 = vmatmul.mubr.msk.bf16.gmra.mrb[24].mxu1 %vm362_vm4, %v4069_v11  ;;  %v1686_v11 = vsel %vm1675_vm8, %v1683_v15, %v1685_v55 }
 0x136   : > { %2778 = vmatprep.mubr.msk.bf16.mxu1 %vm3509_vm1, %v3508_v3 }
 0x137   : > { %2945 = vmatmul.mubr.msk.bf16.gmra.mrb[4].mxu0 %vm362_vm4, %v1680_v10 }
 0x138   : > { %2948 = vmatprep.mubr.msk.bf16.mxu0 %vm3509_vm1, %v3508_v3 }
 0x13d   : > { %2779 = vmatmul.mubr.msk.bf16.gmra.mrb[28].mxu1 %vm362_vm4, %v809_v28  ;;  %v4267_v1 = vmul.u32.u64.low 3817748708, %v1852_v61  ;;  %v4268_v28 = vmul.u32.u64.high 3817748708, %v1852_v61, %v4267_v1 }
 0x13e   : > { %2782 = vmatprep.mubr.msk.bf16.mxu1 %vm3509_vm1, %v3508_v3  ;;  %v4339_v17 = vmul.u32.u64.low 3817748708, %v4323_v42  ;;  %v4340_v1 = vmul.u32.u64.high 3817748708, %v4323_v42, %v4339_v17 }
 0x13f   : > { %2949 = vmatmul.mubr.msk.bf16.gmra.mrb[8].mxu0 %vm362_vm4, %v1682_v2  ;;  %v1854_v2 = vadd.s32 40, %v4239_v36  ;;  %v1906_v49 = vshrl.u32 %v4268_v28, 4  ;;  %v4510_v17 = vadd.s32 128, %v4239_v36 }
 0x140   : > { %2952 = vmatprep.mubr.msk.bf16.mxu0 %vm3509_vm1, %v3508_v3 }
 0x145   : > { %2783 = vmatmul.mubr.msk.bf16.gmra.mrb[32].mxu1 %vm362_vm4, %v811_v45 }
 0x146   : > { %2808 = vmatprep.mubr.msk.bf16.mxu1 %vm3509_vm1, %v3508_v3 }
 0x147   : > { %2953 = vmatmul.mubr.msk.bf16.gmra.mrb[12].mxu0 %vm362_vm4, %v1684_v8  ;;  %v1875_v8 = vsub.s32 %v4239_v36, %v1874_v0  ;;  %v1940_v0 = vmul.u32 18, %v1939_v32 }
 0x148   : > { %2956 = vmatprep.mubr.msk.bf16.mxu0 %vm3509_vm1, %v3508_v3 }
 0x149   : > { %vm2065_vm9 = vcmp.ne.s32.totalorder %v1875_v8, 0  ;;  %vm2083_vm10 = vcmp.lt.s32.totalorder %v1875_v8, 0  ;;  %v2119_v39 = vadd.s32 18, %v1875_v8 }
 0x14a   : > { %vm4296_vm13 = vmand %vm2083_vm10, %vm2065_vm9 }
 0x14d   : > { %2809 = vmatmul.mubr.msk.bf16.vlgmr.msra.gmra.mrb[20].mxu1 %vm362_vm4, %v973_v43  ;;  %v4277_v55 = vmul.u32.u64.low 3817748708, %v1854_v2  ;;  %v4278_v43 = vmul.u32.u64.high 3817748708, %v1854_v2, %v4277_v55 }
 0x14e   : > { %2812 = vmatprep.mubr.msk.bf16.mxu1 %vm3509_vm1, %v3508_v3 }
 0x14f   : > { %2957 = vmatmul.mubr.msk.bf16.gmra.mrb[16].mxu0 %vm362_vm4, %v1686_v11  ;;  %v1928_v51 = vshrl.u32 %v4278_v43, 4 }
 0x150   : > { %2960 = vmatprep.mubr.msk.bf16.mxu0 %vm3509_vm1, %v3508_v3 }
 0x151   : > { %v1929_v24 = vmul.u32 18, %v1928_v51 }
 0x155   : > { %2813 = vmatmul.mubr.msk.bf16.gmra.mrb[24].mxu1 %vm362_vm4, %v977_v5  ;;  %v1896_v5 = vmul.u32 18, %v1895_v23  ;;  %v4362_v23 = vsub.s32 %v4282_v14, %v1940_v0 }
 0x156   : > { %2816 = vmatprep.mubr.msk.bf16.mxu1 %vm3509_vm1, %v3508_v3 }
 0x157   : > { %2961 = vmatmul.mubr.msk.bf16.gmra.mrb[20].mxu0 %vm362_vm4, %v1688_v50 }
 0x158   : > { %2964 = vmatprep.mubr.msk.bf16.mxu0 %vm3509_vm1, %v3508_v3 }
 0x15d   : > { %2817 = vmatmul.mubr.msk.bf16.gmra.mrb[28].mxu1 %vm362_vm4, %v986_v18  ;;  %v2120_v18 = vadd.s32 18, %v1886_v9 }
 0x15e   : > { %2820 = vmatprep.mubr.msk.bf16.mxu1 %vm3509_vm1, %v3508_v3 }
 0x15f   : > { %2965 = vmatmul.mubr.msk.bf16.gmra.mrb[24].mxu0 %vm362_vm4, %v1690_v12  ;;  %v1907_v12 = vmul.u32 18, %v1906_v49  ;;  %v2138_v27 = vsel %vm4301_vm14, %v2120_v18, %v1886_v9 }
 0x160   : > { %2968 = vmatprep.mubr.msk.bf16.mxu0 %vm3509_vm1, %v3508_v3  ;;  %vm4325_vm2 = vcmp.lt.s32.totalorder %v2138_v27, 16  ;;  %v1972_v27 = vshrl.u32 %v4340_v1, 4 }
 0x165   : > { %2821 = vmatmul.mubr.msk.bf16.gmra.mrb[32].mxu1 %vm362_vm4, %v995_v21  ;;  %v1897_v21 = vsub.s32 %v1851_v7, %v1896_v5 }
 0x167   : > { %2969 = vmatmul.mubr.msk.bf16.gmra.mrb[28].mxu0 %vm362_vm4, %v1692_v19  ;;  %v4310_v19 = vmul.u32.u64.low 3817748708, %v4294_v40  ;;  %v4311_v20 = vmul.u32.u64.high 3817748708, %v4294_v40, %v4310_v19  ;;  %vm2067_vm15 = vcmp.ne.s32.totalorder %v1897_v21, 0  ;;  %vm2085_vm0 = vcmp.lt.s32.totalorder %v1897_v21, 0 }
 0x168   : > { %2972 = vmatprep.mubr.msk.bf16.mxu0 %vm3509_vm1, %v3508_v3  ;;  %vm4332_vm3 = vmand %vm2085_vm0, %vm2067_vm15  ;;  %vm2071_vm15 = vcmp.ne.s32.totalorder %v4362_v23, 0  ;;  %vm2089_vm0 = vcmp.lt.s32.totalorder %v4362_v23, 0 }
 0x16f   : > { %2973 = vmatmul.mubr.msk.bf16.gmra.mrb[32].mxu0 %vm362_vm4, %v1694_v22  ;;  %v2137_v22 = vsel %vm4296_vm13, %v2119_v39, %v1875_v8 }
 0x170   : > { %vm2155_vm1 = vcmp.lt.s32.totalorder %v2137_v22, 16 }
 0x1d8   : > { %v4235_v25 = vpop.f32.mrb[0].mxu1 }
 0x1d9   : > { %v2752_v26 = vpop.f32.mrb[1].mxu1 }
 0x1da   : > { %v4237_v29 = vpop.f32.mrb[2].mxu1  ;;  %v1918_v26 = vmul.u32 18, %v1917_v60 }
 0x1db   : > { %v2753_v35 = vpop.f32.mrb[3].mxu1 }
 0x1dc   : > { %v1908_v35 = vsub.s32 %v1852_v61, %v1907_v12  ;;  %v4329_v7 = vsub.s32 %v1853_v38, %v1918_v26  ;;  %v4336_v61 = vsub.s32 %v1854_v2, %v1929_v24  ;;  %v4385_v12 = vadd.s32 88, %v4239_v36 }
 0x1de   : > { %vm2068_vm4 = vcmp.ne.s32.totalorder %v1908_v35, 0  ;;  %vm2086_vm5 = vcmp.lt.s32.totalorder %v1908_v35, 0  ;;  %v2122_v63 = vadd.s32 18, %v1908_v35  ;;  %vm2069_vm7 = vcmp.ne.s32.totalorder %v4329_v7, 0 }
 0x1df   : > { %vm4349_vm6 = vmand %vm2086_vm5, %vm2068_vm4  ;;  %vm2087_vm8 = vcmp.lt.s32.totalorder %v4329_v7, 0  ;;  %v2123_v31 = vadd.s32 18, %v4329_v7  ;;  %vm2070_vm9 = vcmp.ne.s32.totalorder %v4336_v61, 0  ;;  %vm2088_vm10 = vcmp.lt.s32.totalorder %v4336_v61, 0 }
 0x1e0   : > { %v4241_v4 = vpop.f32.mrb[4].mxu1  ;;  %v2140_v49 = vsel %vm4349_vm6, %v2122_v63, %v1908_v35  ;;  %vm4366_vm11 = vmand %vm2087_vm8, %vm2069_vm7  ;;  %v2124_v39 = vadd.s32 18, %v4336_v61 }
 0x1e1   : > { %v2756_v3 = vpop.f32.mrb[5].mxu1  ;;  %vm4380_vm13 = vmand %vm2088_vm10, %vm2070_vm9  ;;  %vm2158_vm14 = vcmp.lt.s32.totalorder %v2140_v49, 16 }
 0x1e2   : > { %v4244_v41 = vpop.f32.mrb[6].mxu1  ;;  %v2142_v24 = vsel %vm4380_vm13, %v2124_v39, %v4336_v61 }
 0x1e3   : > { %v2757_v58 = vpop.f32.mrb[7].mxu1  ;;  %vm4422_vm5 = vcmp.lt.s32.totalorder %v2142_v24, 16 }
 0x1e4   : > { %v4318_v3 = vmul.u32.u64.low 3817748708, %v4307_v34  ;;  %v4319_v58 = vmul.u32.u64.high 3817748708, %v4307_v34, %v4318_v3 }
 0x1e5   : > { %v2125_v3 = vadd.s32 18, %v4362_v23 }
 0x1e6   : > { %v1961_v8 = vshrl.u32 %v4319_v58, 4 }
 0x1e8   : > { %v4253_v48 = vpop.f32.mrb[8].mxu1  ;;  %v1962_v59 = vmul.u32 18, %v1961_v8 }
 0x1e9   : > { %v2760_v6 = vpop.f32.mrb[9].mxu1 }
 0x1ea   : > { %v4256_v52 = vpop.f32.mrb[10].mxu1  ;;  %v2121_v6 = vadd.s32 18, %v1897_v21  ;;  %v4400_v32 = vsub.s32 %v4307_v34, %v1962_v59  ;;  %v1973_v34 = vmul.u32 18, %v1972_v27 }
 0x1eb   : > { %v2761_v53 = vpop.f32.mrb[11].mxu1 }
 0x1ec   : > { %v2139_v2 = vsel %vm4332_vm3, %v2121_v6, %v1897_v21  ;;  %v2141_v21 = vsel %vm4366_vm11, %v2123_v31, %v4329_v7  ;;  %vm2073_vm7 = vcmp.ne.s32.totalorder %v4400_v32, 0  ;;  %vm2091_vm8 = vcmp.lt.s32.totalorder %v4400_v32, 0 }
 0x1ed   : > { %vm2157_vm12 = vcmp.lt.s32.totalorder %v2139_v2, 16  ;;  %vm2159_vm4 = vcmp.lt.s32.totalorder %v2141_v21, 16  ;;  %vm4461_vm9 = vmand %vm2091_vm8, %vm2073_vm7 }
 0x1f0   : > { %v4265_v10 = vpop.f32.mrb[12].mxu1 }
 0x1f1   : > { %v2764_v33 = vpop.f32.mrb[13].mxu1 }
 0x1f2   : > { %v4271_v15 = vpop.f32.mrb[14].mxu1  ;;  %v1950_v33 = vshrl.u32 %v4311_v20, 4 }
 0x1f3   : > { %v2765_v45 = vpop.f32.mrb[15].mxu1 }
 0x1f4   : > { %v4345_v45 = vadd.s32 80, %v4239_v36  ;;  %v1951_v5 = vmul.u32 18, %v1950_v33 }
 0x1f6   : > { %v4371_v44 = vmul.u32.u64.low 3817748708, %v4345_v45  ;;  %v4372_v54 = vmul.u32.u64.high 3817748708, %v4345_v45, %v4371_v44  ;;  %v1952_v22 = vsub.s32 %v4294_v40, %v1951_v5  ;;  %v2127_v5 = vadd.s32 18, %v4400_v32 }
 0x1f8   : > { %v4284_v11 = vpop.f32.mrb[16].mxu1  ;;  %vm2090_vm3 = vcmp.lt.s32.totalorder %v1952_v22, 0 }
 0x1f9   : > { %v2768_v13 = vpop.f32.mrb[17].mxu1 }
 0x1fa   : > { %v4291_v50 = vpop.f32.mrb[18].mxu1 }
 0x1fb   : > { %v2769_v16 = vpop.f32.mrb[19].mxu1 }
 0x202   : > { %v1759_v46 = vpop.f32.mrb[0].mxu0 }
 0x203   : > { %v2978_v53 = vadd.f32 %v1759_v46, %v4235_v25  ;;  %v2942_v56 = vpop.f32.mrb[1].mxu0 }
 0x204   : > { %v1762_v62 = vpop.f32.mrb[2].mxu0  ;;  %v1983_v56 = vshrl.u32 %v4372_v54, 4 }
 0x205   : > { %v2209_v38 = vsel %vm2155_vm1, %v2978_v53, 0.0  ;;  %v2979_v28 = vadd.f32 %v1762_v62, %v4237_v29  ;;  %v2943_v25 = vpop.f32.mrb[3].mxu0  ;;  %vm4410_vm1 = vmand %vm2089_vm0, %vm2071_vm15  ;;  %v4415_v53 = vadd.s32 96, %v4239_v36  ;;  %v4419_v62 = vadd.s32 104, %v4239_v36 }
 0x206   : > { %v2254_v9 = vmul.f32 %v2209_v38, %v2209_v38  ;;  %v2143_v1 = vsel %vm4410_vm1, %v2125_v3, %v4362_v23  ;;  %v1984_v8 = vmul.u32 18, %v1983_v56 }
 0x207   : > { %v2210_v29 = vsel %vm4325_vm2, %v2979_v28, 0.0  ;;  %vm2072_vm2 = vcmp.ne.s32.totalorder %v1952_v22, 0  ;;  %vm2161_vm10 = vcmp.lt.s32.totalorder %v2143_v1, 16 }
 0x208   : > { %v2228_v55 = vadd.f32 %v2210_v29, %v2209_v38  ;;  %v2255_v43 = vmul.f32 %v2210_v29, %v2210_v29  ;;  %v2126_v38 = vadd.s32 18, %v1952_v22  ;;  %vm4430_vm6 = vmand %vm2090_vm3, %vm2072_vm2  ;;  %v4442_v29 = vsub.s32 %v4323_v42, %v1973_v34 }
 0x209   : > { %v4466_v39 = vsub.s32 %v4345_v45, %v1984_v8 }
 0x20a   : > { %v2272_v16 = vadd.f32 %v2255_v43, %v2254_v9  ;;  %v1767_v37 = vpop.f32.mrb[4].mxu0  ;;  %v4445_v43 = vmul.u32.u64.low 3817748708, %v4419_v62  ;;  %v4446_v23 = vmul.u32.u64.high 3817748708, %v4419_v62, %v4445_v43  ;;  %v2144_v13 = vsel %vm4430_vm6, %v2126_v38, %v1952_v22 }
 0x20b   : > { %v2980_v14 = vadd.f32 %v1767_v37, %v4241_v4  ;;  %v2946_v18 = vpop.f32.mrb[5].mxu0  ;;  %vm4468_vm11 = vcmp.lt.s32.totalorder %v2144_v13, 16  ;;  %vm2092_vm13 = vcmp.lt.s32.totalorder %v4442_v29, 0  ;;  %v2128_v24 = vadd.s32 18, %v4442_v29 }
 0x20c   : > { %v1770_v51 = vpop.f32.mrb[6].mxu0  ;;  %vm2093_vm0 = vcmp.lt.s32.totalorder %v4466_v39, 0  ;;  %v2129_v25 = vadd.s32 18, %v4466_v39 }
 0x20d   : > { %v2211_v4 = vsel %vm2157_vm12, %v2980_v14, 0.0  ;;  %v2981_v19 = vadd.f32 %v1770_v51, %v4244_v41  ;;  %v2947_v20 = vpop.f32.mrb[7].mxu0  ;;  %v4403_v46 = vmul.u32.u64.low 3817748708, %v4385_v12  ;;  %v4404_v41 = vmul.u32.u64.high 3817748708, %v4385_v12, %v4403_v46 }
 0x20e   : > { %v2229_v26 = vadd.f32 %v2228_v55, %v2211_v4  ;;  %v2256_v35 = vmul.f32 %v2211_v4, %v2211_v4  ;;  %vm2074_vm12 = vcmp.ne.s32.totalorder %v4442_v29, 0  ;;  %v4476_v4 = vadd.s32 120, %v4239_v36 }
 0x20f   : > { %v2212_v58 = vsel %vm2158_vm14, %v2981_v19, 0.0  ;;  %v2145_v19 = vsel %vm4461_vm9, %v2127_v5, %v4400_v32  ;;  %vm2075_vm14 = vcmp.ne.s32.totalorder %v4466_v39, 0  ;;  %vm4491_vm15 = vmand %vm2092_vm13, %vm2074_vm12  ;;  %v2016_v46 = vshrl.u32 %v4446_v23, 4 }
 0x210   : > { %v2273_v47 = vadd.f32 %v2272_v16, %v2256_v35  ;;  %v2230_v40 = vadd.f32 %v2229_v26, %v2212_v58  ;;  %v2257_v6 = vmul.f32 %v2212_v58, %v2212_v58  ;;  %v4455_v16 = vadd.s32 112, %v4239_v36  ;;  %vm4522_vm2 = vmand %vm2093_vm0, %vm2075_vm14 }
 0x211   : > { %vm4512_vm1 = vcmp.lt.s32.totalorder %v2145_v19, 16 }
 0x212   : > { %v2274_v57 = vadd.f32 %v2273_v47, %v2257_v6  ;;  %v1775_v61 = vpop.f32.mrb[8].mxu0  ;;  %v4483_v22 = vmul.u32.u64.low 3817748708, %v4455_v16  ;;  %v4484_v27 = vmul.u32.u64.high 3817748708, %v4455_v16, %v4483_v22 }
 0x213   : > { %v2982_v63 = vadd.f32 %v1775_v61, %v4253_v48  ;;  %v2950_v0 = vpop.f32.mrb[9].mxu0  ;;  %v4437_v48 = vmul.u32.u64.low 3817748708, %v4415_v53  ;;  %v4438_v33 = vmul.u32.u64.high 3817748708, %v4415_v53, %v4437_v48 }
 0x214   : > { %v1778_v28 = vpop.f32.mrb[10].mxu0  ;;  %v2146_v0 = vsel %vm4491_vm15, %v2128_v24, %v4442_v29  ;;  %v2017_v48 = vmul.u32 18, %v2016_v46 }
 0x215   : > { %v2213_v2 = vsel %vm2159_vm4, %v2982_v63, 0.0  ;;  %v2983_v30 = vadd.f32 %v1778_v28, %v4256_v52  ;;  %v2951_v31 = vpop.f32.mrb[11].mxu0  ;;  %v1994_v52 = vshrl.u32 %v4404_v41, 4  ;;  %v2005_v20 = vshrl.u32 %v4438_v33, 4 }
 0x216   : > { %v2231_v9 = vadd.f32 %v2230_v40, %v2213_v2  ;;  %v2258_v55 = vmul.f32 %v2213_v2, %v2213_v2  ;;  %v4503_v40 = vmul.u32.u64.low 3817748708, %v4476_v4  ;;  %v4504_v6 = vmul.u32.u64.high 3817748708, %v4476_v4, %v4503_v40 }
 0x217   : > { %v2214_v49 = vsel %vm4422_vm5, %v2983_v30, 0.0  ;;  %v1995_v21 = vmul.u32 18, %v1994_v52  ;;  %v2006_v61 = vmul.u32 18, %v2005_v20  ;;  %v4529_v31 = vadd.s32 136, %v4239_v36 }
 0x218   : > { %v2275_v44 = vadd.f32 %v2274_v57, %v2258_v55  ;;  %v2232_v42 = vadd.f32 %v2231_v9, %v2214_v49  ;;  %v2259_v54 = vmul.f32 %v2214_v49, %v2214_v49  ;;  %vm2164_vm5 = vcmp.lt.s32.totalorder %v2146_v0, 16 }
 0x219   : > { %v4500_v47 = vsub.s32 %v4385_v12, %v1995_v21  ;;  %v4533_v8 = vsub.s32 %v4415_v53, %v2006_v61  ;;  %v2027_v9 = vshrl.u32 %v4484_v27, 4  ;;  %v2147_v52 = vsel %vm4522_vm2, %v2129_v25, %v4466_v39 }
 0x21a   : > { %v2276_v14 = vadd.f32 %v2275_v44, %v2259_v54  ;;  %v1783_v18 = vpop.f32.mrb[12].mxu0  ;;  %v4540_v49 = vmul.u32.u64.low 3817748708, %v4510_v17  ;;  %v4541_v13 = vmul.u32.u64.high 3817748708, %v4510_v17, %v4540_v49  ;;  %v2038_v54 = vshrl.u32 %v4504_v6, 4 }
 0x21b   : > { %v2984_v59 = vadd.f32 %v1783_v18, %v4265_v10  ;;  %v2954_v51 = vpop.f32.mrb[13].mxu0  ;;  %vm2076_vm3 = vcmp.ne.s32.totalorder %v4500_v47, 0  ;;  %vm2094_vm4 = vcmp.lt.s32.totalorder %v4500_v47, 0  ;;  %vm2077_vm7 = vcmp.ne.s32.totalorder %v4533_v8, 0 }
 0x21c   : > { %v1786_v45 = vpop.f32.mrb[14].mxu0  ;;  %vm4550_vm6 = vmand %vm2094_vm4, %vm2076_vm3  ;;  %vm2095_vm8 = vcmp.lt.s32.totalorder %v4533_v8, 0  ;;  %vm2165_vm9 = vcmp.lt.s32.totalorder %v2147_v52, 16  ;;  %v2131_v22 = vadd.s32 18, %v4533_v8 }
 0x21d   : > { %v2215_v26 = vsel %vm2161_vm10, %v2984_v59, 0.0  ;;  %v2985_v10 = vadd.f32 %v1786_v45, %v4271_v15  ;;  %v2955_v35 = vpop.f32.mrb[15].mxu0  ;;  %vm4574_vm13 = vmand %vm2095_vm8, %vm2077_vm7 }
 0x21e   : > { %v2233_v3 = vadd.f32 %v2232_v42, %v2215_v26  ;;  %v2260_v58 = vmul.f32 %v2215_v26, %v2215_v26 }
 0x21f   : > { %v2216_v15 = vsel %vm4468_vm11, %v2985_v10, 0.0  ;;  %v2039_v10 = vmul.u32 18, %v2038_v54 }
 0x220   : > { %v1100_v41 = vpop.f32.mrb[20].mxu1  ;;  %v2277_v7 = vadd.f32 %v2276_v14, %v2260_v58  ;;  %v2234_v34 = vadd.f32 %v2233_v3, %v2216_v15  ;;  %v2261_v56 = vmul.f32 %v2216_v15, %v2216_v15 }
 0x221   : > { %v2810_v57 = vpop.f32.mrb[21].mxu1  ;;  %v4559_v37 = vmul.u32.u64.low 3817748708, %v4529_v31  ;;  %v4560_v14 = vmul.u32.u64.high 3817748708, %v4529_v31, %v4559_v37 }
 0x222   : > { %v1103_v63 = vpop.f32.mrb[22].mxu1  ;;  %v2278_v1 = vadd.f32 %v2277_v7, %v2261_v56  ;;  %v1791_v12 = vpop.f32.mrb[16].mxu0  ;;  %v2149_v56 = vsel %vm4574_vm13, %v2131_v22, %v4533_v8  ;;  %v2040_v57 = vsub.s32 %v4476_v4, %v2039_v10 }
 0x223   : > { %v2811_v28 = vpop.f32.mrb[23].mxu1  ;;  %v2986_v33 = vadd.f32 %v1791_v12, %v4284_v11  ;;  %v2958_v2 = vpop.f32.mrb[17].mxu0  ;;  %v2130_v11 = vadd.s32 18, %v4500_v47 }
 0x224   : > { %v1794_v29 = vpop.f32.mrb[18].mxu0  ;;  %vm2080_vm2 = vcmp.ne.s32.totalorder %v2040_v57, 0  ;;  %vm2098_vm3 = vcmp.lt.s32.totalorder %v2040_v57, 0 }
 0x225   : > { %v2217_v55 = vsel %vm4512_vm1, %v2986_v33, 0.0  ;;  %v2987_v43 = vadd.f32 %v1794_v29, %v4291_v50  ;;  %v2959_v23 = vpop.f32.mrb[19].mxu0  ;;  %v4555_v50 = vsub.s32 %v4419_v62, %v2017_v48  ;;  %v2148_v21 = vsel %vm4550_vm6, %v2130_v11, %v4500_v47  ;;  %vm4601_vm6 = vmand %vm2098_vm3, %vm2080_vm2 }
 0x226   : > { %v2235_v36 = vadd.f32 %v2234_v34, %v2217_v55  ;;  %v2262_v5 = vmul.f32 %v2217_v55, %v2217_v55  ;;  %v2028_v62 = vmul.u32 18, %v2027_v9  ;;  %vm2166_vm12 = vcmp.lt.s32.totalorder %v2148_v21, 16 }
 0x227   : > { %v2218_v44 = vsel %vm2164_vm5, %v2987_v43, 0.0  ;;  %vm2078_vm10 = vcmp.ne.s32.totalorder %v4555_v50, 0  ;;  %vm2096_vm11 = vcmp.lt.s32.totalorder %v4555_v50, 0  ;;  %v2132_v3 = vadd.s32 18, %v4555_v50 }
 0x228   : > { %v1108_v42 = vpop.f32.mrb[24].mxu1  ;;  %v2279_v39 = vadd.f32 %v2278_v1, %v2262_v5  ;;  %v2236_v18 = vadd.f32 %v2235_v36, %v2218_v44  ;;  %v2263_v60 = vmul.f32 %v2218_v44, %v2218_v44  ;;  %v2029_v15 = vsub.s32 %v4455_v16, %v2028_v62  ;;  %vm4583_vm14 = vmand %vm2096_vm11, %vm2078_vm10 }
 0x229   : > { %v2814_v59 = vpop.f32.mrb[25].mxu1  ;;  %v2060_v16 = vshrl.u32 %v4560_v14, 4  ;;  %v2150_v38 = vsel %vm4583_vm14, %v2132_v3, %v4555_v50  ;;  %vm2167_vm1 = vcmp.lt.s32.totalorder %v2149_v56, 16  ;;  %v2134_v23 = vadd.s32 18, %v2040_v57 }
 0x22a   : > { %v1111_v51 = vpop.f32.mrb[26].mxu1  ;;  %v2280_v45 = vadd.f32 %v2279_v39, %v2263_v60  ;;  %v1799_v19 = vpop.f32.mrb[20].mxu0  ;;  %vm2079_vm15 = vcmp.ne.s32.totalorder %v2029_v15, 0  ;;  %vm2097_vm0 = vcmp.lt.s32.totalorder %v2029_v15, 0  ;;  %v2133_v2 = vadd.s32 18, %v2029_v15 }
 0x22b   : > { %v2815_v20 = vpop.f32.mrb[27].mxu1  ;;  %v2988_v27 = vadd.f32 %v1799_v19, %v1100_v41  ;;  %v2962_v26 = vpop.f32.mrb[21].mxu0  ;;  %v2049_v41 = vshrl.u32 %v4541_v13, 4  ;;  %v2061_v29 = vmul.u32 18, %v2060_v16  ;;  %vm2168_vm4 = vcmp.lt.s32.totalorder %v2150_v38, 16  ;;  %vm4596_vm5 = vmand %vm2097_vm0, %vm2079_vm15 }
 0x22c   : > { %v1802_v35 = vpop.f32.mrb[22].mxu0  ;;  %v2151_v50 = vsel %vm4596_vm5, %v2133_v2, %v2029_v15 }
 0x22d   : > { %v2219_v58 = vsel %vm2165_vm9, %v2988_v27, 0.0  ;;  %v2989_v32 = vadd.f32 %v1802_v35, %v1103_v63  ;;  %v2963_v46 = vpop.f32.mrb[23].mxu0  ;;  %v2050_v28 = vmul.u32 18, %v2049_v41  ;;  %v2062_v44 = vsub.s32 %v4529_v31, %v2061_v29 }
 0x22e   : > { %v2237_v47 = vadd.f32 %v2236_v18, %v2219_v58  ;;  %v2264_v40 = vmul.f32 %v2219_v58, %v2219_v58  ;;  %vm2169_vm9 = vcmp.lt.s32.totalorder %v2151_v50, 16 }
 0x22f   : > { %v2220_v7 = vsel %vm2166_vm12, %v2989_v32, 0.0  ;;  %v2051_v49 = vsub.s32 %v4510_v17, %v2050_v28  ;;  %v2152_v17 = vsel %vm4601_vm6, %v2134_v23, %v2040_v57  ;;  %vm2082_vm10 = vcmp.ne.s32.totalorder %v2062_v44, 0 }
 0x230   : > { %v1116_v34 = vpop.f32.mrb[28].mxu1  ;;  %v2281_v61 = vadd.f32 %v2280_v45, %v2264_v40  ;;  %v2238_v63 = vadd.f32 %v2237_v47, %v2220_v7  ;;  %v2265_v0 = vmul.f32 %v2220_v7, %v2220_v7  ;;  %vm2100_vm11 = vcmp.lt.s32.totalorder %v2062_v44, 0 }
 0x231   : > { %v2818_v1 = vpop.f32.mrb[29].mxu1  ;;  %vm2081_vm7 = vcmp.ne.s32.totalorder %v2051_v49, 0  ;;  %vm2099_vm8 = vcmp.lt.s32.totalorder %v2051_v49, 0  ;;  %v2135_v62 = vadd.s32 18, %v2051_v49  ;;  %vm2170_vm12 = vcmp.lt.s32.totalorder %v2152_v17, 16  ;;  %vm2118_vm14 = vmand %vm2100_vm11, %vm2082_vm10 }
 0x232   : > { %v1119_v12 = vpop.f32.mrb[30].mxu1  ;;  %v2282_v25 = vadd.f32 %v2281_v61, %v2265_v0  ;;  %v1807_v48 = vpop.f32.mrb[24].mxu0  ;;  %vm4610_vm13 = vmand %vm2099_vm8, %vm2081_vm7  ;;  %v2136_v27 = vadd.s32 18, %v2062_v44 }
 0x233   : > { %v2819_v33 = vpop.f32.mrb[31].mxu1  ;;  %v2990_v4 = vadd.f32 %v1807_v48, %v1108_v42  ;;  %v2966_v30 = vpop.f32.mrb[25].mxu0  ;;  %v2153_v24 = vsel %vm4610_vm13, %v2135_v62, %v2051_v49 }
 0x234   : > { %v1810_v11 = vpop.f32.mrb[26].mxu0  ;;  %v2154_v46 = vsel %vm2118_vm14, %v2136_v27, %v2062_v44  ;;  %vm2171_vm15 = vcmp.lt.s32.totalorder %v2153_v24, 16 }
 0x235   : > { %v2221_v9 = vsel %vm2167_vm1, %v2990_v4, 0.0  ;;  %v2991_v55 = vadd.f32 %v1810_v11, %v1111_v51  ;;  %v2967_v43 = vpop.f32.mrb[27].mxu0  ;;  %vm2172_vm0 = vcmp.lt.s32.totalorder %v2154_v46, 16  ;;  %v2227_v11 = vld [vmem:[%s3614_s20] sm:$0x1] }
 0x236   : > { %v2239_v13 = vadd.f32 %v2238_v63, %v2221_v9  ;;  %v2266_v36 = vmul.f32 %v2221_v9, %v2221_v9 }
 0x237   : > { %v2222_v52 = vsel %vm2168_vm4, %v2991_v55, 0.0  ;;  %v2253_v55 = vld [vmem:[%s3617_s21] sm:$0x1] }
 0x238   : > { %v1124_v53 = vpop.f32.mrb[32].mxu1  ;;  %v2283_v42 = vadd.f32 %v2282_v25, %v2266_v36  ;;  %v2240_v54 = vadd.f32 %v2239_v13, %v2222_v52  ;;  %v2267_v37 = vmul.f32 %v2222_v52, %v2222_v52 }
 0x239   : > { %v2822_v14 = vpop.f32.mrb[33].mxu1 }
 0x23a   : > { %v1127_v39 = vpop.f32.mrb[34].mxu1  ;;  %v2284_v18 = vadd.f32 %v2283_v42, %v2267_v37  ;;  %v1815_v60 = vpop.f32.mrb[28].mxu0 }
 0x23b   : > { %v2823_v59 = vpop.f32.mrb[35].mxu1  ;;  %v2992_v51 = vadd.f32 %v1815_v60, %v1116_v34  ;;  %v2970_v21 = vpop.f32.mrb[29].mxu0 }
 0x23c   : > { %v1818_v31 = vpop.f32.mrb[30].mxu0 }
 0x23d   : > { %v2223_v19 = vsel %vm2169_vm9, %v2992_v51, 0.0  ;;  %v2993_v20 = vadd.f32 %v1818_v31, %v1119_v12  ;;  %v2971_v22 = vpop.f32.mrb[31].mxu0 }
 0x23e   : > { %v2241_v26 = vadd.f32 %v2240_v54, %v2223_v19  ;;  %v2268_v10 = vmul.f32 %v2223_v19, %v2223_v19 }
 0x23f   : > { %v2224_v35 = vsel %vm2170_vm12, %v2993_v20, 0.0 }
 0x240   : > { %v2285_v3 = vadd.f32 %v2284_v18, %v2268_v10  ;;  %v2242_v58 = vadd.f32 %v2241_v26, %v2224_v35  ;;  %v2269_v32 = vmul.f32 %v2224_v35, %v2224_v35 }
 0x242   : > { %v2286_v15 = vadd.f32 %v2285_v3, %v2269_v32  ;;  %v1823_v41 = vpop.f32.mrb[32].mxu0 }
 0x243   : > { %v2994_v47 = vadd.f32 %v1823_v41, %v1124_v53  ;;  %v2974_v40 = vpop.f32.mrb[33].mxu0 }
 0x244   : > { %v1826_v6 = vpop.f32.mrb[34].mxu0 }
 0x245   : > { %v2225_v7 = vsel %vm2171_vm15, %v2994_v47, 0.0  ;;  %v2995_v34 = vadd.f32 %v1826_v6, %v1127_v39  ;;  %v2975_v56 = vpop.f32.mrb[35].mxu0 }
 0x246   : > { %v2243_v57 = vadd.f32 %v2242_v58, %v2225_v7  ;;  %v2270_v16 = vmul.f32 %v2225_v7, %v2225_v7 }
 0x247   : > { %v2226_v61 = vsel %vm2172_vm0, %v2995_v34, 0.0 }
 0x248   : > { %v2287_v63 = vadd.f32 %v2286_v15, %v2270_v16  ;;  %v2244_v0 = vadd.f32 %v2243_v57, %v2226_v61  ;;  %v2271_v1 = vmul.f32 %v2226_v61, %v2226_v61 }
 0x24a   : > { %v2245_v12 = vrot.slane %v2244_v0, 4  ;;  %v2288_v38 = vadd.f32 %v2287_v63, %v2271_v1 }
 0x24c   : > { %v2246_v28 = vadd.f32 %v2245_v12, %v2244_v0  ;;  %v2289_v25 = vrot.slane %v2288_v38, 4 }
 0x24e   : > { %v2247_v48 = vrot.slane %v2246_v28, 2  ;;  %v2290_v33 = vadd.f32 %v2289_v25, %v2288_v38 }
 0x250   : > { %v2248_v2 = vadd.f32 %v2247_v48, %v2246_v28  ;;  %v2291_v4 = vrot.slane %v2290_v33, 2 }
 0x252   : > { %v2249_v30 = vrot.slane %v2248_v2, 1  ;;  %v2292_v29 = vadd.f32 %v2291_v4, %v2290_v33 }
 0x254   : > { %v2250_v8 = vadd.f32 %v2249_v30, %v2248_v2  ;;  %v2293_v9 = vrot.slane %v2292_v29, 1 }
 0x256   : > { %v2251_v43 = vadd.f32 %v2250_v8, %v2227_v11  ;;  %v2294_v23 = vadd.f32 %v2293_v9, %v2292_v29 }
 0x258   : > { %2252 = vst [vmem:[%s3614_s20] sm:$0x1] %v2251_v43  ;;  %v2295_v49 = vadd.f32 %v2294_v23, %v2253_v55 }
 0x259   : > { %3392 = shalt.err (!%p3389_p8)
}
 0x25a   : > { %s3393_s20 = scalar_lea.hbm %s4624_s26, 16  ;;  %s3397_s16 = scalar_lea.hbm %s4711_s2, 32 }
 0x25b   : > { %p3394_p10 = scmp.ne.s32.totalorder %s4624_s26, %s3393_s20  ;;  %p3398_p13 = scmp.lt.u32.totalorder %s4624_s26, %s4711_s2 }
 0x25c   : > { %p3399_p0 = scmp.lt.u32.totalorder %s3397_s16, %s3393_s20  ;;  %p3401_p2 = scmp.lt.u32.totalorder %s3393_s20, %s4624_s26 }
 0x25d   : > { %p3395_p11 = pnand %p3394_p10, %p3581_p3 }
 0x25e   : > { %p3400_p1 = por %p3399_p0, %p3398_p13 }
 0x25f   : > { %p3396_p12 = pneg %p3395_p11 }
 0x260   : > { %p3402_p4 = por %p3401_p2, %p3400_p1 }
 0x262   : > { %p3403_p5 = pnand %p3402_p4, %p3396_p12 }
 0x264   : > { %3406 = shalt.err (!%p3403_p5)
}
 0x265   : > { %3286 = dma.vmem_to_hbm [thread:$0]  (%p3581_p3), %s4626_s7, 16, %s4624_s26, %s2298_s4   ;;  %2296 = vst [vmem:[%s3617_s21] sm:$0x1] %v2295_v49 }
 0x266   : > { %s2302_s15 = scalar_lea.sflag [#allocation5], %s3602_s29  ;;  %s3407_s5 = scalar_lea.vmem %s4634_s8, 16 }
 0x267   : > { %p3408_p6 = scmp.ne.s32.totalorder %s4634_s8, %s3407_s5  ;;  %s3511_s9 = smov [#allocation4]  }
 0x268   : > { %s3411_s20 = sshll.u32 %s3511_s9, 4  ;;  %s3412_s20 = int_to_ptr.vmem [resolvable:$false] %s3411_s20 }
 0x269   : > { %p3409_p7 = pnand %p3408_p6, %p3581_p3  ;;  %s3413_s6 = scalar_lea.vmem %s3412_s20, 32 }
 0x26a   : > { %p3414_p10 = scmp.lt.s32.totalorder %s4634_s8, %s3412_s20  ;;  %p3415_p11 = scmp.lt.s32.totalorder %s3413_s6, %s3407_s5 }
 0x26b   : > { %p3410_p8 = pneg %p3409_p7 }
 0x26c   : > { %p3416_p12 = por %p3415_p11, %p3414_p10 }
 0x26e   : > { %p3417_p13 = pnand %p3416_p12, %p3410_p8 }
 0x270   : > { %3420 = shalt.err (!%p3417_p13)
}
 0x271   : > { %s3421_s29 = scalar_lea.hbm %s4632_s30, 16  ;;  %s3425_s26 = scalar_lea.hbm %s4712_s3, 32 }
 0x272   : > { %p3422_p0 = scmp.ne.s32.totalorder %s4632_s30, %s3421_s29  ;;  %p3426_p4 = scmp.lt.u32.totalorder %s4632_s30, %s4712_s3 }
 0x273   : > { %p3427_p5 = scmp.lt.u32.totalorder %s3425_s26, %s3421_s29  ;;  %p3429_p7 = scmp.lt.u32.totalorder %s3421_s29, %s4632_s30 }
 0x274   : > { %p3423_p1 = pnand %p3422_p0, %p3581_p3 }
 0x275   : > { %p3428_p6 = por %p3427_p5, %p3426_p4 }
 0x276   : > { %p3424_p2 = pneg %p3423_p1 }
 0x277   : > { %p3430_p8 = por %p3429_p7, %p3428_p6 }
 0x279   : > { %p3431_p10 = pnand %p3430_p8, %p3424_p2 }
 0x27b   : > { %3434 = shalt.err (!%p3431_p10)
}
 0x27c   : > { %3287 = dma.vmem_to_hbm [thread:$0]  (%p3581_p3), %s4634_s8, 16, %s4632_s30, %s2302_s15  }
 0x27d PF: > { %p3297_p11 = scmp.ge.s32.totalorder %s3505_s19, 2  ;;  %s2339_s16 = sand.u32 1, %s3477_s12  }
 0x27e   : > { %s2340_s27 = scalar_lea.sflag [#allocation3], %s2339_s16 }
 0x27f   : > { %p3291_p12 = pnand %p3297_p11, %p3591_p9 }
 0x281   : > { %3468 = dma.done.wait (!%p3291_p12), %s2340_s27, 16  }
 0x282   : > { %3470 = vsyncadd (!%p3291_p12), %s2340_s27, 4294967280  ;;  %s2348_s11 = scalar_lea.sflag [#allocation5], %s2339_s16 }
 0x283   : > { %3472 = dma.done.wait (!%p3291_p12), %s2348_s11, 16  }
 0x284   : > { %3474 = vsyncadd (!%p3291_p12), %s2348_s11, 4294967280  ;;  %s20_s19 = sadd.s32 1, %s3505_s19   ;;  %s4757_s12 = smov %s3481_s13 }
 0x285   : > { %p17_p13 = scmp.ge.s32.totalorder %s20_s19, 6   ;;  %s4758_s13 = smov %s3485_s14 }
 0x286   : > { %s4759_s14 = smov %s3599_s28  ;;  %s4760_s15 = smov %s3497_s17 }
 0x287   : > { %s4761_s16 = smov %s3501_s18  ;;  %s4762_s17 = smov %s4765_s22 }
 0x288   : > { %s4763_s18 = smov %s4769_s23  ;;  %19 = sbr.rel (!%p17_p13) target bundleno = 7 (0x7), region = 92 }
 0x28f   :  { %2352 = vsyncpa [#allocation3], 1 }
 0x290   :  { %2354 = vsyncpa [#allocation3 + $0x1], 1 }
 0x291   :  { %2355 = vsyncpa [#allocation5], 1 }
 0x292   :  { %2357 = vsyncpa [#allocation5 + $0x1], 1 }

</bundles_post_ra>
